<compile_context>
chip_gen: v6e
topology: v6e:2x2x1
jax: 0.10.0
libtpu: 0.0.40
codegen_flags: <defaults>
</compile_context>

<pallas_src>
import functools
import math

import numpy as np
import jax
import jax.numpy as jnp
from jax.experimental import pallas as pl
from jax.experimental.pallas import tpu as pltpu

MATMUL_DTYPE = jnp.bfloat16   # MXU operand dtype (accumulation is always f32)
NEG_INF = -1e30               # finite "masked" additive bias (robust vs -inf)
LN_EPS = 1e-5


# ----------------------------------------------------------------------------
# small helpers
# ----------------------------------------------------------------------------
def _round_up(n, m):
    return ((n + m - 1) // m) * m


def _vmem_limit_bytes():
    """~80% of physical per-core VMEM (v5e/v6e: 128 MiB -> ~102, v7x: 64 -> ~51)."""
    try:
        cap = int(pltpu.get_tpu_info().vmem_capacity_bytes)
    except Exception:
        cap = 80 * 1024 * 1024   # conservative fallback
    return int(cap * 0.8)


def _pick_batch_tile(batch, rows):
    """Largest divisor of `batch` with VMEM-friendly row count; grid[0] >= 2 when
    batch > 1 so v7x can shard the 'parallel' axis across its 2 TensorCores."""
    cap = batch // 2 if batch > 1 else 1
    best = 1
    for bt in range(1, cap + 1):
        if batch % bt == 0 and bt * rows <= 1024:
            best = bt
    return best


def _pick_tile(n, max_tile, granule):
    """Largest tile <= max_tile dividing n and a multiple of `granule` (else full n)."""
    if n <= max_tile:
        return n
    for t in range(max_tile, granule - 1, -1):
        if n % t == 0 and t % granule == 0:
            return t
    return n


def _mm(a, b):
    """MXU matmul: bf16 operands, f32 accumulation."""
    return jnp.dot(a.astype(MATMUL_DTYPE), b.astype(MATMUL_DTYPE),
                   preferred_element_type=jnp.float32)


def _layer_norm(x, g, b, eps=LN_EPS):
    mu = jnp.mean(x, axis=-1, keepdims=True)
    var = jnp.mean(jnp.square(x - mu), axis=-1, keepdims=True)
    return (x - mu) * jax.lax.rsqrt(var + eps) * g + b


def _softmax_last(s, approx_recip):
    m = jnp.max(s, axis=-1, keepdims=True)
    e = jnp.exp(s - m)
    d = jnp.sum(e, axis=-1, keepdims=True)
    if approx_recip:
        return e * pl.reciprocal(d, approx=True)   # EUP slot, nearly free
    return e / d


# ----------------------------------------------------------------------------
# shared math (used by the Pallas kernel AND the pure-JAX reference)
# ----------------------------------------------------------------------------
def _multi_head_attention(q, k, v, w_out, bias, *, batch, num_heads, approx_recip):
    """q: (batch*Lq, H), k/v: (batch*Lk, H); returns (batch*Lq, H) (no out-proj bias).

    The 1/sqrt(head_dim) scale is already folded into the q projection weights.
    All MXU operands are bf16; softmax / bias math stays f32.
    """
    n_q, H = q.shape
    lq = n_q // batch
    lk = k.shape[0] // batch
    dh = H // num_heads
    qb = q.reshape(batch, lq, H).astype(MATMUL_DTYPE)
    kb = k.reshape(batch, lk, H).astype(MATMUL_DTYPE)
    vb = v.reshape(batch, lk, H).astype(MATMUL_DTYPE)
    bias3 = bias[None]                       # hoisted out of the head loop
    heads = []
    # Static head loop: lane-slice the fused qkv result per head (relayout-free),
    # collect bf16 head outputs and do ONE fused (N,H)x(H,H) output projection.
    # TODO(synk): for long target sequences, block the self-attn scores over key
    # chunks and skip fully-masked (future) chunks with pl.when.
    for h in range(num_heads):
        sl = slice(h * dh, (h + 1) * dh)
        s = jnp.einsum('bqd,bkd->bqk', qb[:, :, sl], kb[:, :, sl],
                       preferred_element_type=jnp.float32)
        s = s + bias3
        p = _softmax_last(s, approx_recip).astype(MATMUL_DTYPE)
        o = jnp.einsum('bqk,bkd->bqd', p, vb[:, :, sl],
                       preferred_element_type=jnp.float32)
        heads.append(o.astype(MATMUL_DTYPE))
    concat = jnp.concatenate(heads, axis=-1).reshape(n_q, H)
    return _mm(concat, w_out)                # single full-K out-projection


def _decoder_layer_math(xf, memf, params, load, *, batch, num_heads,
                        self_bias, mem_bias, approx_recip):
    """One post-norm nn.TransformerDecoderLayer on flattened rows.

    xf: (batch*Lq, H) f32, memf: (batch*Lk, H) f32.  `params` holds 20 entries
    (refs inside the kernel, arrays in the reference); `load` reads one entry at its
    point of use so weights are never materialized earlier than needed.
    """
    (sa_w_in, sa_b_in, sa_w_out, sa_b_out, ln1_g, ln1_b,
     ca_w_q, ca_b_q, ca_w_kv, ca_b_kv, ca_w_out, ca_b_out, ln2_g, ln2_b,
     ff_w1, ff_b1, ff_w2, ff_b2, ln3_g, ln3_b) = params
    H = xf.shape[-1]

    # --- causal self-attention: ONE fused qkv matmul (shared LHS on the MXU) ---
    qkv = _mm(xf, load(sa_w_in)) + load(sa_b_in)                    # (N, 3H)
    sa = _multi_head_attention(
        qkv[:, :H], qkv[:, H:2 * H], qkv[:, 2 * H:], load(sa_w_out), self_bias,
        batch=batch, num_heads=num_heads, approx_recip=approx_recip) + load(sa_b_out)
    xf = _layer_norm(xf + sa, load(ln1_g), load(ln1_b))

    # --- cross-attention: q from the decoder stream, fused kv from the memory ---
    q = _mm(xf, load(ca_w_q)) + load(ca_b_q)                        # (N, H)
    kv = _mm(memf, load(ca_w_kv)) + load(ca_b_kv)                   # (M, 2H)
    ca = _multi_head_attention(
        q, kv[:, :H], kv[:, H:], load(ca_w_out), mem_bias,
        batch=batch, num_heads=num_heads, approx_recip=approx_recip) + load(ca_b_out)
    xf = _layer_norm(xf + ca, load(ln2_g), load(ln2_b))

    # --- feed-forward (ReLU); cast h1 to bf16 immediately (ff_w2 casts anyway) ---
    h1 = jnp.maximum(_mm(xf, load(ff_w1)) + load(ff_b1), 0.0).astype(MATMUL_DTYPE)
    ff = _mm(h1, load(ff_w2)) + load(ff_b2)
    xf = _layer_norm(xf + ff, load(ln3_g), load(ln3_b))
    return xf


# ----------------------------------------------------------------------------
# Pallas kernels
# ----------------------------------------------------------------------------
def _decoder_stack_kernel(num_heads, src_valid, x_ref, mem_ref, *rest):
    *param_refs, o_ref, resid_ref = rest
    layer = pl.program_id(1)

    bt, lp, h = x_ref.shape
    sp = mem_ref.shape[1]

    # The f32 residual stream lives in VMEM scratch for the whole layer stack.
    @pl.when(layer == 0)
    def _init():
        resid_ref[...] = x_ref[...]

    # Additive biases built in-kernel (VPU iota + where) -> no HBM DMA, no VMEM
    # double-buffering for an (Lp, Lp) f32 mask.
    row = jax.lax.broadcasted_iota(jnp.int32, (lp, lp), 0)
    col = jax.lax.broadcasted_iota(jnp.int32, (lp, lp), 1)
    self_bias = jnp.where(col > row, NEG_INF, 0.0).astype(jnp.float32)
    kcol = jax.lax.broadcasted_iota(jnp.int32, (1, sp), 1)
    mem_bias = jnp.where(kcol < src_valid, 0.0, NEG_INF).astype(jnp.float32)

    xf = resid_ref[...].reshape(bt * lp, h)
    memf = mem_ref[...].reshape(bt * sp, h)
    yf = _decoder_layer_math(
        xf, memf, tuple(param_refs), lambda r: r[0],     # lazy per-use weight reads
        batch=bt, num_heads=num_heads,
        self_bias=self_bias, mem_bias=mem_bias,
        approx_recip=True)
    resid_ref[...] = yf.reshape(bt, lp, h)

    # Only the last layer writes (bf16) to HBM -> half the writeback bytes.
    @pl.when(layer == pl.num_programs(1) - 1)
    def _final():
        o_ref[...] = yf.reshape(bt, lp, h).astype(o_ref.dtype)


def _batch_block_index(b, l):
    return (b, 0, 0)


def _layer_block_index(b, l):
    return (l, 0, 0)


def _stack_cost(B, Bt, Lp, Sp, H, num_heads, layer_params):
    """Advisory CostEstimate numbers for the fused decoder stack."""
    N, M = B * Lp, B * Sp
    num_layers = layer_params[0].shape[0]
    flops = num_layers * (28 * N * H * H + 4 * M * H * H
                          + 4 * B * H * Lp * (Lp + Sp))
    transc = num_layers * num_heads * B * (Lp * Lp + Lp * Sp)
    weight_bytes = sum(int(p.nbytes) for p in layer_params)
    act_bytes = N * H * 4 + M * H * 4 + N * H * 2
    bytes_acc = weight_bytes * max(1, B // Bt) + act_bytes
    return int(flops), int(transc), int(bytes_acc)


def decoder_stack_pallas(x, mem, layer_params, num_heads, src_valid):
    """Fused decoder stack: grid = (batch_tiles, num_layers)."""
    B, Lp, H = x.shape
    Sp = mem.shape[1]
    num_layers = layer_params[0].shape[0]
    Bt = _pick_batch_tile(B, max(Lp, Sp))
    vmem_limit = _vmem_limit_bytes()

    in_specs = [
        pl.BlockSpec((Bt, Lp, H), _batch_block_index),      # x (fetched once per b)
        pl.BlockSpec((Bt, Sp, H), _batch_block_index),      # encoder memory
    ]
    # Layer-indexed weight blocks -> pipeline prefetches layer l+1 during layer l.
    # If the double-buffered weight working set would crowd VMEM (realistic H on
    # v7x's 64 MiB), single-buffer just the big tensors.
    block_bytes = [int(np.prod(p.shape[1:])) * p.dtype.itemsize for p in layer_params]
    single_buffer_big = 2 * sum(block_bytes) > int(0.4 * vmem_limit)
    for p, nbytes in zip(layer_params, block_bytes):
        kwargs = {}
        if single_buffer_big and nbytes >= (2 << 20):
            kwargs["pipeline_mode"] = pl.Buffered(1)
        in_specs.append(pl.BlockSpec((1,) + p.shape[1:], _layer_block_index, **kwargs))
    # TODO(synk): for very large H on v7x, stream ff_w1/ff_w2 from HBM (pl.ANY +
    # pltpu.emit_pipeline chunked over the 4H dim) instead of single-buffering.

    flops, transc, bytes_acc = _stack_cost(B, Bt, Lp, Sp, H, num_heads, layer_params)

    return pl.pallas_call(
        functools.partial(_decoder_stack_kernel, num_heads, src_valid),
        out_shape=jax.ShapeDtypeStruct((B, Lp, H), MATMUL_DTYPE),
        grid=(B // Bt, num_layers),
        in_specs=in_specs,
        out_specs=pl.BlockSpec((Bt, Lp, H), _batch_block_index),
        scratch_shapes=[pltpu.VMEM((Bt, Lp, H), jnp.float32)],   # resident f32 residual
        compiler_params=pltpu.CompilerParams(
            dimension_semantics=("parallel", "arbitrary"),
            vmem_limit_bytes=vmem_limit),
        cost_estimate=pl.CostEstimate(flops=flops, transcendentals=transc,
                                      bytes_accessed=bytes_acc),
    )(x, mem, *layer_params)


def fc_out_pallas(x2d, w, b):
    """Final Linear(H -> num_emb), tiled over rows and a lane-dense padded vocab dim."""
    N, H = x2d.shape
    E = w.shape[1]
    tn = min(2048, _round_up(E, 128))
    Ep = _round_up(E, tn)
    if Ep != E:
        w = jnp.pad(w, ((0, 0), (0, Ep - E)))
        b = jnp.pad(b, ((0, 0), (0, Ep - E)))
    tm = _pick_tile(N, 512, 8)

    def kernel(x_ref, w_ref, b_ref, o_ref):
        o_ref[...] = _mm(x_ref[...], w_ref[...]) + b_ref[...]

    flops = 2 * N * H * Ep
    bytes_acc = (N * H * x2d.dtype.itemsize + H * Ep * w.dtype.itemsize + N * Ep * 4)

    out = pl.pallas_call(
        kernel,
        out_shape=jax.ShapeDtypeStruct((N, Ep), jnp.float32),
        grid=(N // tm, Ep // tn),
        in_specs=[
            pl.BlockSpec((tm, H), lambda i, j: (i, 0)),
            pl.BlockSpec((H, tn), lambda i, j: (0, j)),
            pl.BlockSpec((1, tn), lambda i, j: (0, j)),
        ],
        out_specs=pl.BlockSpec((tm, tn), lambda i, j: (i, j)),
        compiler_params=pltpu.CompilerParams(
            dimension_semantics=("parallel", "parallel"),
            vmem_limit_bytes=_vmem_limit_bytes()),
        cost_estimate=pl.CostEstimate(flops=int(flops), transcendentals=0,
                                      bytes_accessed=int(bytes_acc)),
    )(x2d, w, b)
    return out[:, :E]


# ----------------------------------------------------------------------------
# parameters, embeddings, forward passes
# ----------------------------------------------------------------------------
def sinusoidal_pos_emb(x, dim):
    half = dim // 2
    freq = math.log(10000.0) / (half - 1)
    freq = jnp.exp(jnp.arange(half, dtype=jnp.float32) * -freq)
    ang = x.astype(jnp.float32)[:, None] * freq[None, :]
    return jnp.concatenate([jnp.sin(ang), jnp.cos(ang)], axis=-1)


def _causal_bias(n):
    idx = jnp.arange(n)
    return jnp.where(idx[None, :] > idx[:, None], NEG_INF, 0.0).astype(jnp.float32)


def _key_pad_bias(valid, padded):
    return jnp.where(jnp.arange(padded) < valid, 0.0, NEG_INF).astype(jnp.float32)[None, :]


def init_params(key, num_emb, hidden, num_layers, num_heads):
    """Synthetic parameters; weights stored bf16 (MXU operands), biases/LN in f32.
    Per-layer tensors are stacked with a leading num_layers axis for the fused kernel.
    The attention 1/sqrt(head_dim) scale is folded into the q projections (when
    importing real PyTorch weights, do the same fold at conversion time)."""
    H, NL = hidden, num_layers
    scale = 1.0 / math.sqrt(H // num_heads)

    def uni(k, fan_in, shape, dtype=jnp.float32):
        bound = 1.0 / math.sqrt(fan_in)
        return jax.random.uniform(k, shape, jnp.float32, -bound, bound).astype(dtype)

    ks = iter(jax.random.split(key, 32))
    wdt = MATMUL_DTYPE

    sa_w_in = uni(next(ks), H, (NL, H, 3 * H), wdt)   # combined qkv, transposed
    sa_b_in = uni(next(ks), H, (NL, 1, 3 * H))
    sa_w_in = sa_w_in.at[:, :, :H].multiply(scale)    # fold 1/sqrt(dh) into q cols
    sa_b_in = sa_b_in.at[:, :, :H].multiply(scale)
    ca_w_q = uni(next(ks), H, (NL, H, H), wdt) * scale
    ca_b_q = uni(next(ks), H, (NL, 1, H)) * scale

    layers = [
        sa_w_in, sa_b_in,
        uni(next(ks), H, (NL, H, H), wdt),         # sa_w_out
        uni(next(ks), H, (NL, 1, H)),              # sa_b_out
        jnp.ones((NL, 1, H), jnp.float32),         # ln1_gamma
        jnp.zeros((NL, 1, H), jnp.float32),        # ln1_beta
        ca_w_q, ca_b_q,
        uni(next(ks), H, (NL, H, 2 * H), wdt),     # ca_w_kv   (fused k,v proj)
        uni(next(ks), H, (NL, 1, 2 * H)),          # ca_b_kv
        uni(next(ks), H, (NL, H, H), wdt),         # ca_w_out
        uni(next(ks), H, (NL, 1, H)),              # ca_b_out
        jnp.ones((NL, 1, H), jnp.float32),         # ln2_gamma
        jnp.zeros((NL, 1, H), jnp.float32),        # ln2_beta
        uni(next(ks), H, (NL, H, 4 * H), wdt),     # ff_w1
        uni(next(ks), H, (NL, 1, 4 * H)),          # ff_b1
        uni(next(ks), 4 * H, (NL, 4 * H, H), wdt), # ff_w2
        uni(next(ks), 4 * H, (NL, 1, H)),          # ff_b2
        jnp.ones((NL, 1, H), jnp.float32),         # ln3_gamma
        jnp.zeros((NL, 1, H), jnp.float32),        # ln3_beta
    ]
    emb_w = 0.001 * jax.random.normal(next(ks), (num_emb, H), jnp.float32)
    fc_w = uni(next(ks), H, (H, num_emb), wdt)
    fc_b = uni(next(ks), H, (1, num_emb))
    return {"embedding": emb_w, "layers": layers, "fc_w": fc_w, "fc_b": fc_b}


def _prepare_inputs(params, input_seq, encoder_output):
    emb_w = params["embedding"]
    B, L = input_seq.shape
    H = emb_w.shape[1]
    S = encoder_output.shape[1]
    x = emb_w[input_seq] + sinusoidal_pos_emb(jnp.arange(L), H)[None]
    # Pad sequence dims to sublane multiples so in-kernel flattening is layout-trivial.
    Lp, Sp = _round_up(L, 8), _round_up(S, 8)
    x = jnp.pad(x, ((0, 0), (0, Lp - L), (0, 0)))
    mem = jnp.pad(encoder_output.astype(jnp.float32), ((0, 0), (0, Sp - S), (0, 0)))
    return x, mem, L, Lp, S, Sp


def decoder_forward(params, input_seq, encoder_output, num_heads):
    x, mem, L, Lp, S, Sp = _prepare_inputs(params, input_seq, encoder_output)
    B, _, H = x.shape
    y = decoder_stack_pallas(x, mem, params["layers"], num_heads, S)   # bf16 handoff
    logits = fc_out_pallas(y.reshape(B * Lp, H), params["fc_w"], params["fc_b"])
    E = params["fc_w"].shape[1]
    return logits.reshape(B, Lp, E)[:, :L]


def decoder_forward_ref(params, input_seq, encoder_output, num_heads):
    """Pure-JAX reference (same math / same bf16 casts, exact softmax divide)."""
    x, mem, L, Lp, S, Sp = _prepare_inputs(params, input_seq, encoder_output)
    B, _, H = x.shape
    self_bias = _causal_bias(Lp)       # identical to the in-kernel iota construction
    mem_bias = _key_pad_bias(S, Sp)
    xf = x.reshape(B * Lp, H)
    memf = mem.reshape(B * Sp, H)
    num_layers = params["layers"][0].shape[0]
    for l in range(num_layers):
        lp = tuple(p[l] for p in params["layers"])
        xf = _decoder_layer_math(xf, memf, lp, lambda a: a,
                                 batch=B, num_heads=num_heads,
                                 self_bias=self_bias, mem_bias=mem_bias,
                                 approx_recip=False)
    xf = xf.astype(MATMUL_DTYPE)       # match the kernel's bf16 handoff to fc_out
    logits = _mm(xf, params["fc_w"]) + params["fc_b"]
    E = params["fc_w"].shape[1]
    return logits.reshape(B, Lp, E)[:, :L]


# ----------------------------------------------------------------------------
if __name__ == "__main__":
    NUM_EMB, HIDDEN, NUM_LAYERS, NUM_HEADS = 16, 32, 3, 4
    B, L, S = 2, 8, 10

    key = jax.random.PRNGKey(0)
    kp, ks, km = jax.random.split(key, 3)

    params = init_params(kp, NUM_EMB, HIDDEN, NUM_LAYERS, NUM_HEADS)
    input_seq = jax.random.randint(ks, (B, L), 0, NUM_EMB, dtype=jnp.int32)
    encoder_output = jax.random.normal(km, (B, S, HIDDEN), dtype=jnp.float32)

    out = decoder_forward(params, input_seq, encoder_output, NUM_HEADS)
    out = jax.block_until_ready(out)
    assert out.shape == (B, L, NUM_EMB)

    ref = decoder_forward_ref(params, input_seq, encoder_output, NUM_HEADS)
    np.testing.assert_allclose(np.asarray(out, dtype=np.float32),
                               np.asarray(ref, dtype=np.float32),
                               rtol=1e-2, atol=1e-2)

    print("KERNEL_OK")
</pallas_src>

<mosaic_0001>
module attributes {stable_mosaic.version = 11 : i64} {
  func.func @_decoder_stack_kernel(%arg0: i32, %arg1: i32, %arg2: memref<1x8x32xf32, #tpu.memory_space<vmem>>, %arg3: memref<1x16x32xf32, #tpu.memory_space<vmem>>, %arg4: memref<1x32x96xbf16, #tpu.memory_space<vmem>>, %arg5: memref<1x1x96xf32, #tpu.memory_space<vmem>>, %arg6: memref<1x32x32xbf16, #tpu.memory_space<vmem>>, %arg7: memref<1x1x32xf32, #tpu.memory_space<vmem>>, %arg8: memref<1x1x32xf32, #tpu.memory_space<vmem>>, %arg9: memref<1x1x32xf32, #tpu.memory_space<vmem>>, %arg10: memref<1x32x32xbf16, #tpu.memory_space<vmem>>, %arg11: memref<1x1x32xf32, #tpu.memory_space<vmem>>, %arg12: memref<1x32x64xbf16, #tpu.memory_space<vmem>>, %arg13: memref<1x1x64xf32, #tpu.memory_space<vmem>>, %arg14: memref<1x32x32xbf16, #tpu.memory_space<vmem>>, %arg15: memref<1x1x32xf32, #tpu.memory_space<vmem>>, %arg16: memref<1x1x32xf32, #tpu.memory_space<vmem>>, %arg17: memref<1x1x32xf32, #tpu.memory_space<vmem>>, %arg18: memref<1x32x128xbf16, #tpu.memory_space<vmem>>, %arg19: memref<1x1x128xf32, #tpu.memory_space<vmem>>, %arg20: memref<1x128x32xbf16, #tpu.memory_space<vmem>>, %arg21: memref<1x1x32xf32, #tpu.memory_space<vmem>>, %arg22: memref<1x1x32xf32, #tpu.memory_space<vmem>>, %arg23: memref<1x1x32xf32, #tpu.memory_space<vmem>>, %arg24: memref<1x8x32xbf16, #tpu.memory_space<vmem>>, %arg25: memref<1x8x32xf32, #tpu.memory_space<vmem>>) attributes {dimension_semantics = [#tpu.dimension_semantics<parallel>, #tpu.dimension_semantics<arbitrary>], iteration_bounds = array<i64: 2, 3>, scalar_prefetch = 0 : i64, scratch_operands = 1 : i64, tpu.core_type = #tpu.core_type<tc>, window_params = [{transform_indices = @transform_0, window_bounds = array<i64: 1, 8, 32>}, {transform_indices = @transform_1, window_bounds = array<i64: 1, 16, 32>}, {transform_indices = @transform_2, window_bounds = array<i64: 1, 32, 96>}, {transform_indices = @transform_3, window_bounds = array<i64: 1, 1, 96>}, {transform_indices = @transform_4, window_bounds = array<i64: 1, 32, 32>}, {transform_indices = @transform_5, window_bounds = array<i64: 1, 1, 32>}, {transform_indices = @transform_6, window_bounds = array<i64: 1, 1, 32>}, {transform_indices = @transform_7, window_bounds = array<i64: 1, 1, 32>}, {transform_indices = @transform_8, window_bounds = array<i64: 1, 32, 32>}, {transform_indices = @transform_9, window_bounds = array<i64: 1, 1, 32>}, {transform_indices = @transform_10, window_bounds = array<i64: 1, 32, 64>}, {transform_indices = @transform_11, window_bounds = array<i64: 1, 1, 64>}, {transform_indices = @transform_12, window_bounds = array<i64: 1, 32, 32>}, {transform_indices = @transform_13, window_bounds = array<i64: 1, 1, 32>}, {transform_indices = @transform_14, window_bounds = array<i64: 1, 1, 32>}, {transform_indices = @transform_15, window_bounds = array<i64: 1, 1, 32>}, {transform_indices = @transform_16, window_bounds = array<i64: 1, 32, 128>}, {transform_indices = @transform_17, window_bounds = array<i64: 1, 1, 128>}, {transform_indices = @transform_18, window_bounds = array<i64: 1, 128, 32>}, {transform_indices = @transform_19, window_bounds = array<i64: 1, 1, 32>}, {transform_indices = @transform_20, window_bounds = array<i64: 1, 1, 32>}, {transform_indices = @transform_21, window_bounds = array<i64: 1, 1, 32>}, {transform_indices = @transform_22, window_bounds = array<i64: 1, 8, 32>}]} {
    %c0_i32 = arith.constant 0 : i32
    %0 = arith.cmpi eq, %arg1, %c0_i32 : i32
    %1 = arith.extui %0 : i1 to i32
    %c0_i32_0 = arith.constant 0 : i32
    %2 = arith.cmpi ne, %1, %c0_i32_0 : i32
    scf.if %2 {
      %c0_128 = arith.constant 0 : index
      %c0_129 = arith.constant 0 : index
      %c0_130 = arith.constant 0 : index
      %332 = vector.load %arg2[%c0_128, %c0_129, %c0_130] : memref<1x8x32xf32, #tpu.memory_space<vmem>>, vector<1x8x32xf32>
      %c0_131 = arith.constant 0 : index
      %c0_132 = arith.constant 0 : index
      %c0_133 = arith.constant 0 : index
      %333 = vector.load %arg25[%c0_131, %c0_132, %c0_133] : memref<1x8x32xf32, #tpu.memory_space<vmem>>, vector<1x8x32xf32>
      tpu.vector_store %arg25[%c0_131, %c0_132, %c0_133], %332 {strides = array<i32>} : memref<1x8x32xf32, #tpu.memory_space<vmem>>, vector<1x8x32xf32>,
    } else {
    }
    %3 = tpu.iota {dimensions = array<i32: 0>} : vector<8x8xi32>
    %4 = tpu.iota {dimensions = array<i32: 1>} : vector<8x8xi32>
    %5 = arith.cmpi sgt, %4, %3 : vector<8x8xi32>
    %cst = arith.constant -1.000000e+30 : f32
    %cst_1 = arith.constant 0.000000e+00 : f32
    %6 = vector.broadcast %cst : f32 to vector<8x8xf32>
    %7 = vector.broadcast %cst_1 : f32 to vector<8x8xf32>
    %8 = arith.select %5, %6, %7 : vector<8x8xi1>, vector<8x8xf32>
    %9 = tpu.iota {dimensions = array<i32: 1>} : vector<1x16xi32>
    %c10_i32 = arith.constant 10 : i32
    %10 = vector.broadcast %c10_i32 : i32 to vector<1x16xi32>
    %11 = arith.cmpi slt, %9, %10 : vector<1x16xi32>
    %cst_2 = arith.constant 0.000000e+00 : f32
    %cst_3 = arith.constant -1.000000e+30 : f32
    %12 = vector.broadcast %cst_2 : f32 to vector<1x16xf32>
    %13 = vector.broadcast %cst_3 : f32 to vector<1x16xf32>
    %14 = arith.select %11, %12, %13 : vector<1x16xi1>, vector<1x16xf32>
    %c0 = arith.constant 0 : index
    %c0_4 = arith.constant 0 : index
    %c0_5 = arith.constant 0 : index
    %15 = vector.load %arg25[%c0, %c0_4, %c0_5] : memref<1x8x32xf32, #tpu.memory_space<vmem>>, vector<1x8x32xf32>
    %16 = vector.shape_cast %15 : vector<1x8x32xf32> to vector<8x32xf32>
    %c0_6 = arith.constant 0 : index
    %c0_7 = arith.constant 0 : index
    %c0_8 = arith.constant 0 : index
    %17 = vector.load %arg3[%c0_6, %c0_7, %c0_8] : memref<1x16x32xf32, #tpu.memory_space<vmem>>, vector<1x16x32xf32>
    %18 = vector.shape_cast %17 : vector<1x16x32xf32> to vector<16x32xf32>
    %c0_9 = arith.constant 0 : index
    %c0_10 = arith.constant 0 : index
    %c0_11 = arith.constant 0 : index
    %19 = vector.load %arg4[%c0_9, %c0_10, %c0_11] : memref<1x32x96xbf16, #tpu.memory_space<vmem>>, vector<1x32x96xbf16>
    %20 = vector.shape_cast %19 : vector<1x32x96xbf16> to vector<32x96xbf16>
    %21 = arith.truncf %16 : vector<8x32xf32> to vector<8x32xbf16>
    %cst_12 = arith.constant dense<0.000000e+00> : vector<8x96xf32>
    %22 = tpu.matmul %21, %20, %cst_12 {dimension_numbers = #tpu.dot_dimension_numbers<[1], [0], [0], [1], [0, 0, 1, 1], [], []>} : vector<8x32xbf16>, vector<32x96xbf16>, vector<8x96xf32> -> vector<8x96xf32>
    %c0_13 = arith.constant 0 : index
    %c0_14 = arith.constant 0 : index
    %c0_15 = arith.constant 0 : index
    %23 = vector.load %arg5[%c0_13, %c0_14, %c0_15] : memref<1x1x96xf32, #tpu.memory_space<vmem>>, vector<1x1x96xf32>
    %24 = vector.shape_cast %23 : vector<1x1x96xf32> to vector<1x96xf32>
    %25 = vector.broadcast %24 : vector<1x96xf32> to vector<8x96xf32>
    %26 = arith.addf %22, %25 : vector<8x96xf32>
    %27 = vector.extract_strided_slice %26 {offsets = [0, 0], sizes = [8, 32], strides = [1, 1]} : vector<8x96xf32> to vector<8x32xf32>
    %28 = vector.extract_strided_slice %26 {offsets = [0, 32], sizes = [8, 32], strides = [1, 1]} : vector<8x96xf32> to vector<8x32xf32>
    %29 = vector.extract_strided_slice %26 {offsets = [0, 64], sizes = [8, 32], strides = [1, 1]} : vector<8x96xf32> to vector<8x32xf32>
    %c0_16 = arith.constant 0 : index
    %c0_17 = arith.constant 0 : index
    %c0_18 = arith.constant 0 : index
    %30 = vector.load %arg6[%c0_16, %c0_17, %c0_18] : memref<1x32x32xbf16, #tpu.memory_space<vmem>>, vector<1x32x32xbf16>
    %31 = vector.shape_cast %30 : vector<1x32x32xbf16> to vector<32x32xbf16>
    %32 = vector.shape_cast %27 : vector<8x32xf32> to vector<1x8x32xf32>
    %33 = arith.truncf %32 : vector<1x8x32xf32> to vector<1x8x32xbf16>
    %34 = vector.shape_cast %28 : vector<8x32xf32> to vector<1x8x32xf32>
    %35 = arith.truncf %34 : vector<1x8x32xf32> to vector<1x8x32xbf16>
    %36 = vector.shape_cast %29 : vector<8x32xf32> to vector<1x8x32xf32>
    %37 = arith.truncf %36 : vector<1x8x32xf32> to vector<1x8x32xbf16>
    %38 = vector.shape_cast %8 : vector<8x8xf32> to vector<1x8x8xf32>
    %39 = vector.extract_strided_slice %33 {offsets = [0, 0, 0], sizes = [1, 8, 8], strides = [1, 1, 1]} : vector<1x8x32xbf16> to vector<1x8x8xbf16>
    %40 = vector.extract_strided_slice %35 {offsets = [0, 0, 0], sizes = [1, 8, 8], strides = [1, 1, 1]} : vector<1x8x32xbf16> to vector<1x8x8xbf16>
    "tpu.trace_start"() <{level = 10 : i32, message = "bqd,bkd->bqk"}> : () -> ()
    %cst_19 = arith.constant dense<0.000000e+00> : vector<1x8x8xf32>
    %41 = tpu.matmul %39, %40, %cst_19 {dimension_numbers = #tpu.dot_dimension_numbers<[2], [2], [1], [1], [0, 0, 0, 1, 1, 1], [0], [0]>} : vector<1x8x8xbf16>, vector<1x8x8xbf16>, vector<1x8x8xf32> -> vector<1x8x8xf32>
    "tpu.trace_stop"() : () -> ()
    %42 = arith.addf %41, %38 : vector<1x8x8xf32>
    %cst_20 = arith.constant dense<0xFF800000> : vector<1x8xf32>
    %43 = vector.multi_reduction <maximumf>, %42, %cst_20 [2] : vector<1x8x8xf32> to vector<1x8xf32>
    %44 = vector.shape_cast %43 : vector<1x8xf32> to vector<1x8x1xf32>
    %45 = vector.broadcast %44 : vector<1x8x1xf32> to vector<1x8x8xf32>
    %46 = arith.subf %42, %45 : vector<1x8x8xf32>
    %47 = math.exp %46 : vector<1x8x8xf32>
    %cst_21 = arith.constant dense<0.000000e+00> : vector<1x8xf32>
    %48 = vector.multi_reduction <add>, %47, %cst_21 [2] : vector<1x8x8xf32> to vector<1x8xf32>
    %49 = vector.shape_cast %48 : vector<1x8xf32> to vector<1x8x1xf32>
    %50 = tpu.reciprocal %49 {approx = true} : vector<1x8x1xf32> -> vector<1x8x1xf32>
    %51 = vector.broadcast %50 : vector<1x8x1xf32> to vector<1x8x8xf32>
    %52 = arith.mulf %47, %51 : vector<1x8x8xf32>
    %53 = arith.truncf %52 : vector<1x8x8xf32> to vector<1x8x8xbf16>
    %54 = vector.extract_strided_slice %37 {offsets = [0, 0, 0], sizes = [1, 8, 8], strides = [1, 1, 1]} : vector<1x8x32xbf16> to vector<1x8x8xbf16>
    "tpu.trace_start"() <{level = 10 : i32, message = "bqk,bkd->bqd"}> : () -> ()
    %cst_22 = arith.constant dense<0.000000e+00> : vector<1x8x8xf32>
    %55 = tpu.matmul %53, %54, %cst_22 {dimension_numbers = #tpu.dot_dimension_numbers<[2], [1], [1], [2], [0, 0, 0, 1, 1, 2], [0], [0]>} : vector<1x8x8xbf16>, vector<1x8x8xbf16>, vector<1x8x8xf32> -> vector<1x8x8xf32>
    "tpu.trace_stop"() : () -> ()
    %56 = arith.truncf %55 : vector<1x8x8xf32> to vector<1x8x8xbf16>
    %57 = vector.extract_strided_slice %33 {offsets = [0, 0, 8], sizes = [1, 8, 8], strides = [1, 1, 1]} : vector<1x8x32xbf16> to vector<1x8x8xbf16>
    %58 = vector.extract_strided_slice %35 {offsets = [0, 0, 8], sizes = [1, 8, 8], strides = [1, 1, 1]} : vector<1x8x32xbf16> to vector<1x8x8xbf16>
    "tpu.trace_start"() <{level = 10 : i32, message = "bqd,bkd->bqk"}> : () -> ()
    %cst_23 = arith.constant dense<0.000000e+00> : vector<1x8x8xf32>
    %59 = tpu.matmul %57, %58, %cst_23 {dimension_numbers = #tpu.dot_dimension_numbers<[2], [2], [1], [1], [0, 0, 0, 1, 1, 1], [0], [0]>} : vector<1x8x8xbf16>, vector<1x8x8xbf16>, vector<1x8x8xf32> -> vector<1x8x8xf32>
    "tpu.trace_stop"() : () -> ()
    %60 = arith.addf %59, %38 : vector<1x8x8xf32>
    %cst_24 = arith.constant dense<0xFF800000> : vector<1x8xf32>
    %61 = vector.multi_reduction <maximumf>, %60, %cst_24 [2] : vector<1x8x8xf32> to vector<1x8xf32>
    %62 = vector.shape_cast %61 : vector<1x8xf32> to vector<1x8x1xf32>
    %63 = vector.broadcast %62 : vector<1x8x1xf32> to vector<1x8x8xf32>
    %64 = arith.subf %60, %63 : vector<1x8x8xf32>
    %65 = math.exp %64 : vector<1x8x8xf32>
    %cst_25 = arith.constant dense<0.000000e+00> : vector<1x8xf32>
    %66 = vector.multi_reduction <add>, %65, %cst_25 [2] : vector<1x8x8xf32> to vector<1x8xf32>
    %67 = vector.shape_cast %66 : vector<1x8xf32> to vector<1x8x1xf32>
    %68 = tpu.reciprocal %67 {approx = true} : vector<1x8x1xf32> -> vector<1x8x1xf32>
    %69 = vector.broadcast %68 : vector<1x8x1xf32> to vector<1x8x8xf32>
    %70 = arith.mulf %65, %69 : vector<1x8x8xf32>
    %71 = arith.truncf %70 : vector<1x8x8xf32> to vector<1x8x8xbf16>
    %72 = vector.extract_strided_slice %37 {offsets = [0, 0, 8], sizes = [1, 8, 8], strides = [1, 1, 1]} : vector<1x8x32xbf16> to vector<1x8x8xbf16>
    "tpu.trace_start"() <{level = 10 : i32, message = "bqk,bkd->bqd"}> : () -> ()
    %cst_26 = arith.constant dense<0.000000e+00> : vector<1x8x8xf32>
    %73 = tpu.matmul %71, %72, %cst_26 {dimension_numbers = #tpu.dot_dimension_numbers<[2], [1], [1], [2], [0, 0, 0, 1, 1, 2], [0], [0]>} : vector<1x8x8xbf16>, vector<1x8x8xbf16>, vector<1x8x8xf32> -> vector<1x8x8xf32>
    "tpu.trace_stop"() : () -> ()
    %74 = arith.truncf %73 : vector<1x8x8xf32> to vector<1x8x8xbf16>
    %75 = vector.extract_strided_slice %33 {offsets = [0, 0, 16], sizes = [1, 8, 8], strides = [1, 1, 1]} : vector<1x8x32xbf16> to vector<1x8x8xbf16>
    %76 = vector.extract_strided_slice %35 {offsets = [0, 0, 16], sizes = [1, 8, 8], strides = [1, 1, 1]} : vector<1x8x32xbf16> to vector<1x8x8xbf16>
    "tpu.trace_start"() <{level = 10 : i32, message = "bqd,bkd->bqk"}> : () -> ()
    %cst_27 = arith.constant dense<0.000000e+00> : vector<1x8x8xf32>
    %77 = tpu.matmul %75, %76, %cst_27 {dimension_numbers = #tpu.dot_dimension_numbers<[2], [2], [1], [1], [0, 0, 0, 1, 1, 1], [0], [0]>} : vector<1x8x8xbf16>, vector<1x8x8xbf16>, vector<1x8x8xf32> -> vector<1x8x8xf32>
    "tpu.trace_stop"() : () -> ()
    %78 = arith.addf %77, %38 : vector<1x8x8xf32>
    %cst_28 = arith.constant dense<0xFF800000> : vector<1x8xf32>
    %79 = vector.multi_reduction <maximumf>, %78, %cst_28 [2] : vector<1x8x8xf32> to vector<1x8xf32>
    %80 = vector.shape_cast %79 : vector<1x8xf32> to vector<1x8x1xf32>
    %81 = vector.broadcast %80 : vector<1x8x1xf32> to vector<1x8x8xf32>
    %82 = arith.subf %78, %81 : vector<1x8x8xf32>
    %83 = math.exp %82 : vector<1x8x8xf32>
    %cst_29 = arith.constant dense<0.000000e+00> : vector<1x8xf32>
    %84 = vector.multi_reduction <add>, %83, %cst_29 [2] : vector<1x8x8xf32> to vector<1x8xf32>
    %85 = vector.shape_cast %84 : vector<1x8xf32> to vector<1x8x1xf32>
    %86 = tpu.reciprocal %85 {approx = true} : vector<1x8x1xf32> -> vector<1x8x1xf32>
    %87 = vector.broadcast %86 : vector<1x8x1xf32> to vector<1x8x8xf32>
    %88 = arith.mulf %83, %87 : vector<1x8x8xf32>
    %89 = arith.truncf %88 : vector<1x8x8xf32> to vector<1x8x8xbf16>
    %90 = vector.extract_strided_slice %37 {offsets = [0, 0, 16], sizes = [1, 8, 8], strides = [1, 1, 1]} : vector<1x8x32xbf16> to vector<1x8x8xbf16>
    "tpu.trace_start"() <{level = 10 : i32, message = "bqk,bkd->bqd"}> : () -> ()
    %cst_30 = arith.constant dense<0.000000e+00> : vector<1x8x8xf32>
    %91 = tpu.matmul %89, %90, %cst_30 {dimension_numbers = #tpu.dot_dimension_numbers<[2], [1], [1], [2], [0, 0, 0, 1, 1, 2], [0], [0]>} : vector<1x8x8xbf16>, vector<1x8x8xbf16>, vector<1x8x8xf32> -> vector<1x8x8xf32>
    "tpu.trace_stop"() : () -> ()
    %92 = arith.truncf %91 : vector<1x8x8xf32> to vector<1x8x8xbf16>
    %93 = vector.extract_strided_slice %33 {offsets = [0, 0, 24], sizes = [1, 8, 8], strides = [1, 1, 1]} : vector<1x8x32xbf16> to vector<1x8x8xbf16>
    %94 = vector.extract_strided_slice %35 {offsets = [0, 0, 24], sizes = [1, 8, 8], strides = [1, 1, 1]} : vector<1x8x32xbf16> to vector<1x8x8xbf16>
    "tpu.trace_start"() <{level = 10 : i32, message = "bqd,bkd->bqk"}> : () -> ()
    %cst_31 = arith.constant dense<0.000000e+00> : vector<1x8x8xf32>
    %95 = tpu.matmul %93, %94, %cst_31 {dimension_numbers = #tpu.dot_dimension_numbers<[2], [2], [1], [1], [0, 0, 0, 1, 1, 1], [0], [0]>} : vector<1x8x8xbf16>, vector<1x8x8xbf16>, vector<1x8x8xf32> -> vector<1x8x8xf32>
    "tpu.trace_stop"() : () -> ()
    %96 = arith.addf %95, %38 : vector<1x8x8xf32>
    %cst_32 = arith.constant dense<0xFF800000> : vector<1x8xf32>
    %97 = vector.multi_reduction <maximumf>, %96, %cst_32 [2] : vector<1x8x8xf32> to vector<1x8xf32>
    %98 = vector.shape_cast %97 : vector<1x8xf32> to vector<1x8x1xf32>
    %99 = vector.broadcast %98 : vector<1x8x1xf32> to vector<1x8x8xf32>
    %100 = arith.subf %96, %99 : vector<1x8x8xf32>
    %101 = math.exp %100 : vector<1x8x8xf32>
    %cst_33 = arith.constant dense<0.000000e+00> : vector<1x8xf32>
    %102 = vector.multi_reduction <add>, %101, %cst_33 [2] : vector<1x8x8xf32> to vector<1x8xf32>
    %103 = vector.shape_cast %102 : vector<1x8xf32> to vector<1x8x1xf32>
    %104 = tpu.reciprocal %103 {approx = true} : vector<1x8x1xf32> -> vector<1x8x1xf32>
    %105 = vector.broadcast %104 : vector<1x8x1xf32> to vector<1x8x8xf32>
    %106 = arith.mulf %101, %105 : vector<1x8x8xf32>
    %107 = arith.truncf %106 : vector<1x8x8xf32> to vector<1x8x8xbf16>
    %108 = vector.extract_strided_slice %37 {offsets = [0, 0, 24], sizes = [1, 8, 8], strides = [1, 1, 1]} : vector<1x8x32xbf16> to vector<1x8x8xbf16>
    "tpu.trace_start"() <{level = 10 : i32, message = "bqk,bkd->bqd"}> : () -> ()
    %cst_34 = arith.constant dense<0.000000e+00> : vector<1x8x8xf32>
    %109 = tpu.matmul %107, %108, %cst_34 {dimension_numbers = #tpu.dot_dimension_numbers<[2], [1], [1], [2], [0, 0, 0, 1, 1, 2], [0], [0]>} : vector<1x8x8xbf16>, vector<1x8x8xbf16>, vector<1x8x8xf32> -> vector<1x8x8xf32>
    "tpu.trace_stop"() : () -> ()
    %110 = arith.truncf %109 : vector<1x8x8xf32> to vector<1x8x8xbf16>
    %111 = tpu.concatenate %56, %74, %92, %110 in 2 : vector<1x8x8xbf16>, vector<1x8x8xbf16>, vector<1x8x8xbf16>, vector<1x8x8xbf16> -> vector<1x8x32xbf16>
    %112 = vector.shape_cast %111 : vector<1x8x32xbf16> to vector<8x32xbf16>
    %cst_35 = arith.constant dense<0.000000e+00> : vector<8x32xf32>
    %113 = tpu.matmul %112, %31, %cst_35 {dimension_numbers = #tpu.dot_dimension_numbers<[1], [0], [0], [1], [0, 0, 1, 1], [], []>} : vector<8x32xbf16>, vector<32x32xbf16>, vector<8x32xf32> -> vector<8x32xf32>
    %c0_36 = arith.constant 0 : index
    %c0_37 = arith.constant 0 : index
    %c0_38 = arith.constant 0 : index
    %114 = vector.load %arg7[%c0_36, %c0_37, %c0_38] : memref<1x1x32xf32, #tpu.memory_space<vmem>>, vector<1x1x32xf32>
    %115 = vector.shape_cast %114 : vector<1x1x32xf32> to vector<1x32xf32>
    %116 = vector.broadcast %115 : vector<1x32xf32> to vector<8x32xf32>
    %117 = arith.addf %113, %116 : vector<8x32xf32>
    %118 = arith.addf %16, %117 : vector<8x32xf32>
    %c0_39 = arith.constant 0 : index
    %c0_40 = arith.constant 0 : index
    %c0_41 = arith.constant 0 : index
    %119 = vector.load %arg8[%c0_39, %c0_40, %c0_41] : memref<1x1x32xf32, #tpu.memory_space<vmem>>, vector<1x1x32xf32>
    %120 = vector.shape_cast %119 : vector<1x1x32xf32> to vector<1x32xf32>
    %c0_42 = arith.constant 0 : index
    %c0_43 = arith.constant 0 : index
    %c0_44 = arith.constant 0 : index
    %121 = vector.load %arg9[%c0_42, %c0_43, %c0_44] : memref<1x1x32xf32, #tpu.memory_space<vmem>>, vector<1x1x32xf32>
    %122 = vector.shape_cast %121 : vector<1x1x32xf32> to vector<1x32xf32>
    %cst_45 = arith.constant dense<0.000000e+00> : vector<8xf32>
    %123 = vector.multi_reduction <add>, %118, %cst_45 [1] : vector<8x32xf32> to vector<8xf32>
    %124 = vector.shape_cast %123 : vector<8xf32> to vector<8x1xf32>
    %cst_46 = arith.constant 3.200000e+01 : f32
    %125 = vector.broadcast %cst_46 : f32 to vector<8x1xf32>
    %126 = arith.divf %124, %125 : vector<8x1xf32>
    %127 = vector.broadcast %126 : vector<8x1xf32> to vector<8x32xf32>
    %128 = arith.subf %118, %127 : vector<8x32xf32>
    %129 = arith.mulf %128, %128 : vector<8x32xf32>
    %cst_47 = arith.constant dense<0.000000e+00> : vector<8xf32>
    %130 = vector.multi_reduction <add>, %129, %cst_47 [1] : vector<8x32xf32> to vector<8xf32>
    %131 = vector.shape_cast %130 : vector<8xf32> to vector<8x1xf32>
    %cst_48 = arith.constant 3.200000e+01 : f32
    %132 = vector.broadcast %cst_48 : f32 to vector<8x1xf32>
    %133 = arith.divf %131, %132 : vector<8x1xf32>
    %134 = vector.broadcast %126 : vector<8x1xf32> to vector<8x32xf32>
    %135 = arith.subf %118, %134 : vector<8x32xf32>
    %cst_49 = arith.constant 9.99999974E-6 : f32
    %136 = vector.broadcast %cst_49 : f32 to vector<8x1xf32>
    %137 = arith.addf %133, %136 : vector<8x1xf32>
    %138 = math.rsqrt %137 : vector<8x1xf32>
    %139 = vector.broadcast %138 : vector<8x1xf32> to vector<8x32xf32>
    %140 = arith.mulf %135, %139 : vector<8x32xf32>
    %141 = vector.broadcast %120 : vector<1x32xf32> to vector<8x32xf32>
    %142 = arith.mulf %140, %141 : vector<8x32xf32>
    %143 = vector.broadcast %122 : vector<1x32xf32> to vector<8x32xf32>
    %144 = arith.addf %142, %143 : vector<8x32xf32>
    %c0_50 = arith.constant 0 : index
    %c0_51 = arith.constant 0 : index
    %c0_52 = arith.constant 0 : index
    %145 = vector.load %arg10[%c0_50, %c0_51, %c0_52] : memref<1x32x32xbf16, #tpu.memory_space<vmem>>, vector<1x32x32xbf16>
    %146 = vector.shape_cast %145 : vector<1x32x32xbf16> to vector<32x32xbf16>
    %147 = arith.truncf %144 : vector<8x32xf32> to vector<8x32xbf16>
    %cst_53 = arith.constant dense<0.000000e+00> : vector<8x32xf32>
    %148 = tpu.matmul %147, %146, %cst_53 {dimension_numbers = #tpu.dot_dimension_numbers<[1], [0], [0], [1], [0, 0, 1, 1], [], []>} : vector<8x32xbf16>, vector<32x32xbf16>, vector<8x32xf32> -> vector<8x32xf32>
    %c0_54 = arith.constant 0 : index
    %c0_55 = arith.constant 0 : index
    %c0_56 = arith.constant 0 : index
    %149 = vector.load %arg11[%c0_54, %c0_55, %c0_56] : memref<1x1x32xf32, #tpu.memory_space<vmem>>, vector<1x1x32xf32>
    %150 = vector.shape_cast %149 : vector<1x1x32xf32> to vector<1x32xf32>
    %151 = vector.broadcast %150 : vector<1x32xf32> to vector<8x32xf32>
    %152 = arith.addf %148, %151 : vector<8x32xf32>
    %c0_57 = arith.constant 0 : index
    %c0_58 = arith.constant 0 : index
    %c0_59 = arith.constant 0 : index
    %153 = vector.load %arg12[%c0_57, %c0_58, %c0_59] : memref<1x32x64xbf16, #tpu.memory_space<vmem>>, vector<1x32x64xbf16>
    %154 = vector.shape_cast %153 : vector<1x32x64xbf16> to vector<32x64xbf16>
    %155 = arith.truncf %18 : vector<16x32xf32> to vector<16x32xbf16>
    %cst_60 = arith.constant dense<0.000000e+00> : vector<16x64xf32>
    %156 = tpu.matmul %155, %154, %cst_60 {dimension_numbers = #tpu.dot_dimension_numbers<[1], [0], [0], [1], [0, 0, 1, 1], [], []>} : vector<16x32xbf16>, vector<32x64xbf16>, vector<16x64xf32> -> vector<16x64xf32>
    %c0_61 = arith.constant 0 : index
    %c0_62 = arith.constant 0 : index
    %c0_63 = arith.constant 0 : index
    %157 = vector.load %arg13[%c0_61, %c0_62, %c0_63] : memref<1x1x64xf32, #tpu.memory_space<vmem>>, vector<1x1x64xf32>
    %158 = vector.shape_cast %157 : vector<1x1x64xf32> to vector<1x64xf32>
    %159 = vector.broadcast %158 : vector<1x64xf32> to vector<16x64xf32>
    %160 = arith.addf %156, %159 : vector<16x64xf32>
    %161 = vector.extract_strided_slice %160 {offsets = [0, 0], sizes = [16, 32], strides = [1, 1]} : vector<16x64xf32> to vector<16x32xf32>
    %162 = vector.extract_strided_slice %160 {offsets = [0, 32], sizes = [16, 32], strides = [1, 1]} : vector<16x64xf32> to vector<16x32xf32>
    %c0_64 = arith.constant 0 : index
    %c0_65 = arith.constant 0 : index
    %c0_66 = arith.constant 0 : index
    %163 = vector.load %arg14[%c0_64, %c0_65, %c0_66] : memref<1x32x32xbf16, #tpu.memory_space<vmem>>, vector<1x32x32xbf16>
    %164 = vector.shape_cast %163 : vector<1x32x32xbf16> to vector<32x32xbf16>
    %165 = vector.shape_cast %152 : vector<8x32xf32> to vector<1x8x32xf32>
    %166 = arith.truncf %165 : vector<1x8x32xf32> to vector<1x8x32xbf16>
    %167 = vector.shape_cast %161 : vector<16x32xf32> to vector<1x16x32xf32>
    %168 = arith.truncf %167 : vector<1x16x32xf32> to vector<1x16x32xbf16>
    %169 = vector.shape_cast %162 : vector<16x32xf32> to vector<1x16x32xf32>
    %170 = arith.truncf %169 : vector<1x16x32xf32> to vector<1x16x32xbf16>
    %171 = vector.shape_cast %14 : vector<1x16xf32> to vector<1x1x16xf32>
    %172 = vector.extract_strided_slice %166 {offsets = [0, 0, 0], sizes = [1, 8, 8], strides = [1, 1, 1]} : vector<1x8x32xbf16> to vector<1x8x8xbf16>
    %173 = vector.extract_strided_slice %168 {offsets = [0, 0, 0], sizes = [1, 16, 8], strides = [1, 1, 1]} : vector<1x16x32xbf16> to vector<1x16x8xbf16>
    "tpu.trace_start"() <{level = 10 : i32, message = "bqd,bkd->bqk"}> : () -> ()
    %cst_67 = arith.constant dense<0.000000e+00> : vector<1x8x16xf32>
    %174 = tpu.matmul %172, %173, %cst_67 {dimension_numbers = #tpu.dot_dimension_numbers<[2], [2], [1], [1], [0, 0, 0, 1, 1, 1], [0], [0]>} : vector<1x8x8xbf16>, vector<1x16x8xbf16>, vector<1x8x16xf32> -> vector<1x8x16xf32>
    "tpu.trace_stop"() : () -> ()
    %175 = vector.broadcast %171 : vector<1x1x16xf32> to vector<1x8x16xf32>
    %176 = arith.addf %174, %175 : vector<1x8x16xf32>
    %cst_68 = arith.constant dense<0xFF800000> : vector<1x8xf32>
    %177 = vector.multi_reduction <maximumf>, %176, %cst_68 [2] : vector<1x8x16xf32> to vector<1x8xf32>
    %178 = vector.shape_cast %177 : vector<1x8xf32> to vector<1x8x1xf32>
    %179 = vector.broadcast %178 : vector<1x8x1xf32> to vector<1x8x16xf32>
    %180 = arith.subf %176, %179 : vector<1x8x16xf32>
    %181 = math.exp %180 : vector<1x8x16xf32>
    %cst_69 = arith.constant dense<0.000000e+00> : vector<1x8xf32>
    %182 = vector.multi_reduction <add>, %181, %cst_69 [2] : vector<1x8x16xf32> to vector<1x8xf32>
    %183 = vector.shape_cast %182 : vector<1x8xf32> to vector<1x8x1xf32>
    %184 = tpu.reciprocal %183 {approx = true} : vector<1x8x1xf32> -> vector<1x8x1xf32>
    %185 = vector.broadcast %184 : vector<1x8x1xf32> to vector<1x8x16xf32>
    %186 = arith.mulf %181, %185 : vector<1x8x16xf32>
    %187 = arith.truncf %186 : vector<1x8x16xf32> to vector<1x8x16xbf16>
    %188 = vector.extract_strided_slice %170 {offsets = [0, 0, 0], sizes = [1, 16, 8], strides = [1, 1, 1]} : vector<1x16x32xbf16> to vector<1x16x8xbf16>
    "tpu.trace_start"() <{level = 10 : i32, message = "bqk,bkd->bqd"}> : () -> ()
    %cst_70 = arith.constant dense<0.000000e+00> : vector<1x8x8xf32>
    %189 = tpu.matmul %187, %188, %cst_70 {dimension_numbers = #tpu.dot_dimension_numbers<[2], [1], [1], [2], [0, 0, 0, 1, 1, 2], [0], [0]>} : vector<1x8x16xbf16>, vector<1x16x8xbf16>, vector<1x8x8xf32> -> vector<1x8x8xf32>
    "tpu.trace_stop"() : () -> ()
    %190 = arith.truncf %189 : vector<1x8x8xf32> to vector<1x8x8xbf16>
    %191 = vector.extract_strided_slice %166 {offsets = [0, 0, 8], sizes = [1, 8, 8], strides = [1, 1, 1]} : vector<1x8x32xbf16> to vector<1x8x8xbf16>
    %192 = vector.extract_strided_slice %168 {offsets = [0, 0, 8], sizes = [1, 16, 8], strides = [1, 1, 1]} : vector<1x16x32xbf16> to vector<1x16x8xbf16>
    "tpu.trace_start"() <{level = 10 : i32, message = "bqd,bkd->bqk"}> : () -> ()
    %cst_71 = arith.constant dense<0.000000e+00> : vector<1x8x16xf32>
    %193 = tpu.matmul %191, %192, %cst_71 {dimension_numbers = #tpu.dot_dimension_numbers<[2], [2], [1], [1], [0, 0, 0, 1, 1, 1], [0], [0]>} : vector<1x8x8xbf16>, vector<1x16x8xbf16>, vector<1x8x16xf32> -> vector<1x8x16xf32>
    "tpu.trace_stop"() : () -> ()
    %194 = vector.broadcast %171 : vector<1x1x16xf32> to vector<1x8x16xf32>
    %195 = arith.addf %193, %194 : vector<1x8x16xf32>
    %cst_72 = arith.constant dense<0xFF800000> : vector<1x8xf32>
    %196 = vector.multi_reduction <maximumf>, %195, %cst_72 [2] : vector<1x8x16xf32> to vector<1x8xf32>
    %197 = vector.shape_cast %196 : vector<1x8xf32> to vector<1x8x1xf32>
    %198 = vector.broadcast %197 : vector<1x8x1xf32> to vector<1x8x16xf32>
    %199 = arith.subf %195, %198 : vector<1x8x16xf32>
    %200 = math.exp %199 : vector<1x8x16xf32>
    %cst_73 = arith.constant dense<0.000000e+00> : vector<1x8xf32>
    %201 = vector.multi_reduction <add>, %200, %cst_73 [2] : vector<1x8x16xf32> to vector<1x8xf32>
    %202 = vector.shape_cast %201 : vector<1x8xf32> to vector<1x8x1xf32>
    %203 = tpu.reciprocal %202 {approx = true} : vector<1x8x1xf32> -> vector<1x8x1xf32>
    %204 = vector.broadcast %203 : vector<1x8x1xf32> to vector<1x8x16xf32>
    %205 = arith.mulf %200, %204 : vector<1x8x16xf32>
    %206 = arith.truncf %205 : vector<1x8x16xf32> to vector<1x8x16xbf16>
    %207 = vector.extract_strided_slice %170 {offsets = [0, 0, 8], sizes = [1, 16, 8], strides = [1, 1, 1]} : vector<1x16x32xbf16> to vector<1x16x8xbf16>
    "tpu.trace_start"() <{level = 10 : i32, message = "bqk,bkd->bqd"}> : () -> ()
    %cst_74 = arith.constant dense<0.000000e+00> : vector<1x8x8xf32>
    %208 = tpu.matmul %206, %207, %cst_74 {dimension_numbers = #tpu.dot_dimension_numbers<[2], [1], [1], [2], [0, 0, 0, 1, 1, 2], [0], [0]>} : vector<1x8x16xbf16>, vector<1x16x8xbf16>, vector<1x8x8xf32> -> vector<1x8x8xf32>
    "tpu.trace_stop"() : () -> ()
    %209 = arith.truncf %208 : vector<1x8x8xf32> to vector<1x8x8xbf16>
    %210 = vector.extract_strided_slice %166 {offsets = [0, 0, 16], sizes = [1, 8, 8], strides = [1, 1, 1]} : vector<1x8x32xbf16> to vector<1x8x8xbf16>
    %211 = vector.extract_strided_slice %168 {offsets = [0, 0, 16], sizes = [1, 16, 8], strides = [1, 1, 1]} : vector<1x16x32xbf16> to vector<1x16x8xbf16>
    "tpu.trace_start"() <{level = 10 : i32, message = "bqd,bkd->bqk"}> : () -> ()
    %cst_75 = arith.constant dense<0.000000e+00> : vector<1x8x16xf32>
    %212 = tpu.matmul %210, %211, %cst_75 {dimension_numbers = #tpu.dot_dimension_numbers<[2], [2], [1], [1], [0, 0, 0, 1, 1, 1], [0], [0]>} : vector<1x8x8xbf16>, vector<1x16x8xbf16>, vector<1x8x16xf32> -> vector<1x8x16xf32>
    "tpu.trace_stop"() : () -> ()
    %213 = vector.broadcast %171 : vector<1x1x16xf32> to vector<1x8x16xf32>
    %214 = arith.addf %212, %213 : vector<1x8x16xf32>
    %cst_76 = arith.constant dense<0xFF800000> : vector<1x8xf32>
    %215 = vector.multi_reduction <maximumf>, %214, %cst_76 [2] : vector<1x8x16xf32> to vector<1x8xf32>
    %216 = vector.shape_cast %215 : vector<1x8xf32> to vector<1x8x1xf32>
    %217 = vector.broadcast %216 : vector<1x8x1xf32> to vector<1x8x16xf32>
    %218 = arith.subf %214, %217 : vector<1x8x16xf32>
    %219 = math.exp %218 : vector<1x8x16xf32>
    %cst_77 = arith.constant dense<0.000000e+00> : vector<1x8xf32>
    %220 = vector.multi_reduction <add>, %219, %cst_77 [2] : vector<1x8x16xf32> to vector<1x8xf32>
    %221 = vector.shape_cast %220 : vector<1x8xf32> to vector<1x8x1xf32>
    %222 = tpu.reciprocal %221 {approx = true} : vector<1x8x1xf32> -> vector<1x8x1xf32>
    %223 = vector.broadcast %222 : vector<1x8x1xf32> to vector<1x8x16xf32>
    %224 = arith.mulf %219, %223 : vector<1x8x16xf32>
    %225 = arith.truncf %224 : vector<1x8x16xf32> to vector<1x8x16xbf16>
    %226 = vector.extract_strided_slice %170 {offsets = [0, 0, 16], sizes = [1, 16, 8], strides = [1, 1, 1]} : vector<1x16x32xbf16> to vector<1x16x8xbf16>
    "tpu.trace_start"() <{level = 10 : i32, message = "bqk,bkd->bqd"}> : () -> ()
    %cst_78 = arith.constant dense<0.000000e+00> : vector<1x8x8xf32>
    %227 = tpu.matmul %225, %226, %cst_78 {dimension_numbers = #tpu.dot_dimension_numbers<[2], [1], [1], [2], [0, 0, 0, 1, 1, 2], [0], [0]>} : vector<1x8x16xbf16>, vector<1x16x8xbf16>, vector<1x8x8xf32> -> vector<1x8x8xf32>
    "tpu.trace_stop"() : () -> ()
    %228 = arith.truncf %227 : vector<1x8x8xf32> to vector<1x8x8xbf16>
    %229 = vector.extract_strided_slice %166 {offsets = [0, 0, 24], sizes = [1, 8, 8], strides = [1, 1, 1]} : vector<1x8x32xbf16> to vector<1x8x8xbf16>
    %230 = vector.extract_strided_slice %168 {offsets = [0, 0, 24], sizes = [1, 16, 8], strides = [1, 1, 1]} : vector<1x16x32xbf16> to vector<1x16x8xbf16>
    "tpu.trace_start"() <{level = 10 : i32, message = "bqd,bkd->bqk"}> : () -> ()
    %cst_79 = arith.constant dense<0.000000e+00> : vector<1x8x16xf32>
    %231 = tpu.matmul %229, %230, %cst_79 {dimension_numbers = #tpu.dot_dimension_numbers<[2], [2], [1], [1], [0, 0, 0, 1, 1, 1], [0], [0]>} : vector<1x8x8xbf16>, vector<1x16x8xbf16>, vector<1x8x16xf32> -> vector<1x8x16xf32>
    "tpu.trace_stop"() : () -> ()
    %232 = vector.broadcast %171 : vector<1x1x16xf32> to vector<1x8x16xf32>
    %233 = arith.addf %231, %232 : vector<1x8x16xf32>
    %cst_80 = arith.constant dense<0xFF800000> : vector<1x8xf32>
    %234 = vector.multi_reduction <maximumf>, %233, %cst_80 [2] : vector<1x8x16xf32> to vector<1x8xf32>
    %235 = vector.shape_cast %234 : vector<1x8xf32> to vector<1x8x1xf32>
    %236 = vector.broadcast %235 : vector<1x8x1xf32> to vector<1x8x16xf32>
    %237 = arith.subf %233, %236 : vector<1x8x16xf32>
    %238 = math.exp %237 : vector<1x8x16xf32>
    %cst_81 = arith.constant dense<0.000000e+00> : vector<1x8xf32>
    %239 = vector.multi_reduction <add>, %238, %cst_81 [2] : vector<1x8x16xf32> to vector<1x8xf32>
    %240 = vector.shape_cast %239 : vector<1x8xf32> to vector<1x8x1xf32>
    %241 = tpu.reciprocal %240 {approx = true} : vector<1x8x1xf32> -> vector<1x8x1xf32>
    %242 = vector.broadcast %241 : vector<1x8x1xf32> to vector<1x8x16xf32>
    %243 = arith.mulf %238, %242 : vector<1x8x16xf32>
    %244 = arith.truncf %243 : vector<1x8x16xf32> to vector<1x8x16xbf16>
    %245 = vector.extract_strided_slice %170 {offsets = [0, 0, 24], sizes = [1, 16, 8], strides = [1, 1, 1]} : vector<1x16x32xbf16> to vector<1x16x8xbf16>
    "tpu.trace_start"() <{level = 10 : i32, message = "bqk,bkd->bqd"}> : () -> ()
    %cst_82 = arith.constant dense<0.000000e+00> : vector<1x8x8xf32>
    %246 = tpu.matmul %244, %245, %cst_82 {dimension_numbers = #tpu.dot_dimension_numbers<[2], [1], [1], [2], [0, 0, 0, 1, 1, 2], [0], [0]>} : vector<1x8x16xbf16>, vector<1x16x8xbf16>, vector<1x8x8xf32> -> vector<1x8x8xf32>
    "tpu.trace_stop"() : () -> ()
    %247 = arith.truncf %246 : vector<1x8x8xf32> to vector<1x8x8xbf16>
    %248 = tpu.concatenate %190, %209, %228, %247 in 2 : vector<1x8x8xbf16>, vector<1x8x8xbf16>, vector<1x8x8xbf16>, vector<1x8x8xbf16> -> vector<1x8x32xbf16>
    %249 = vector.shape_cast %248 : vector<1x8x32xbf16> to vector<8x32xbf16>
    %cst_83 = arith.constant dense<0.000000e+00> : vector<8x32xf32>
    %250 = tpu.matmul %249, %164, %cst_83 {dimension_numbers = #tpu.dot_dimension_numbers<[1], [0], [0], [1], [0, 0, 1, 1], [], []>} : vector<8x32xbf16>, vector<32x32xbf16>, vector<8x32xf32> -> vector<8x32xf32>
    %c0_84 = arith.constant 0 : index
    %c0_85 = arith.constant 0 : index
    %c0_86 = arith.constant 0 : index
    %251 = vector.load %arg15[%c0_84, %c0_85, %c0_86] : memref<1x1x32xf32, #tpu.memory_space<vmem>>, vector<1x1x32xf32>
    %252 = vector.shape_cast %251 : vector<1x1x32xf32> to vector<1x32xf32>
    %253 = vector.broadcast %252 : vector<1x32xf32> to vector<8x32xf32>
    %254 = arith.addf %250, %253 : vector<8x32xf32>
    %255 = arith.addf %144, %254 : vector<8x32xf32>
    %c0_87 = arith.constant 0 : index
    %c0_88 = arith.constant 0 : index
    %c0_89 = arith.constant 0 : index
    %256 = vector.load %arg16[%c0_87, %c0_88, %c0_89] : memref<1x1x32xf32, #tpu.memory_space<vmem>>, vector<1x1x32xf32>
    %257 = vector.shape_cast %256 : vector<1x1x32xf32> to vector<1x32xf32>
    %c0_90 = arith.constant 0 : index
    %c0_91 = arith.constant 0 : index
    %c0_92 = arith.constant 0 : index
    %258 = vector.load %arg17[%c0_90, %c0_91, %c0_92] : memref<1x1x32xf32, #tpu.memory_space<vmem>>, vector<1x1x32xf32>
    %259 = vector.shape_cast %258 : vector<1x1x32xf32> to vector<1x32xf32>
    %cst_93 = arith.constant dense<0.000000e+00> : vector<8xf32>
    %260 = vector.multi_reduction <add>, %255, %cst_93 [1] : vector<8x32xf32> to vector<8xf32>
    %261 = vector.shape_cast %260 : vector<8xf32> to vector<8x1xf32>
    %cst_94 = arith.constant 3.200000e+01 : f32
    %262 = vector.broadcast %cst_94 : f32 to vector<8x1xf32>
    %263 = arith.divf %261, %262 : vector<8x1xf32>
    %264 = vector.broadcast %263 : vector<8x1xf32> to vector<8x32xf32>
    %265 = arith.subf %255, %264 : vector<8x32xf32>
    %266 = arith.mulf %265, %265 : vector<8x32xf32>
    %cst_95 = arith.constant dense<0.000000e+00> : vector<8xf32>
    %267 = vector.multi_reduction <add>, %266, %cst_95 [1] : vector<8x32xf32> to vector<8xf32>
    %268 = vector.shape_cast %267 : vector<8xf32> to vector<8x1xf32>
    %cst_96 = arith.constant 3.200000e+01 : f32
    %269 = vector.broadcast %cst_96 : f32 to vector<8x1xf32>
    %270 = arith.divf %268, %269 : vector<8x1xf32>
    %271 = vector.broadcast %263 : vector<8x1xf32> to vector<8x32xf32>
    %272 = arith.subf %255, %271 : vector<8x32xf32>
    %cst_97 = arith.constant 9.99999974E-6 : f32
    %273 = vector.broadcast %cst_97 : f32 to vector<8x1xf32>
    %274 = arith.addf %270, %273 : vector<8x1xf32>
    %275 = math.rsqrt %274 : vector<8x1xf32>
    %276 = vector.broadcast %275 : vector<8x1xf32> to vector<8x32xf32>
    %277 = arith.mulf %272, %276 : vector<8x32xf32>
    %278 = vector.broadcast %257 : vector<1x32xf32> to vector<8x32xf32>
    %279 = arith.mulf %277, %278 : vector<8x32xf32>
    %280 = vector.broadcast %259 : vector<1x32xf32> to vector<8x32xf32>
    %281 = arith.addf %279, %280 : vector<8x32xf32>
    %c0_98 = arith.constant 0 : index
    %c0_99 = arith.constant 0 : index
    %c0_100 = arith.constant 0 : index
    %282 = vector.load %arg18[%c0_98, %c0_99, %c0_100] : memref<1x32x128xbf16, #tpu.memory_space<vmem>>, vector<1x32x128xbf16>
    %283 = vector.shape_cast %282 : vector<1x32x128xbf16> to vector<32x128xbf16>
    %284 = arith.truncf %281 : vector<8x32xf32> to vector<8x32xbf16>
    %cst_101 = arith.constant dense<0.000000e+00> : vector<8x128xf32>
    %285 = tpu.matmul %284, %283, %cst_101 {dimension_numbers = #tpu.dot_dimension_numbers<[1], [0], [0], [1], [0, 0, 1, 1], [], []>} : vector<8x32xbf16>, vector<32x128xbf16>, vector<8x128xf32> -> vector<8x128xf32>
    %c0_102 = arith.constant 0 : index
    %c0_103 = arith.constant 0 : index
    %c0_104 = arith.constant 0 : index
    %286 = vector.load %arg19[%c0_102, %c0_103, %c0_104] : memref<1x1x128xf32, #tpu.memory_space<vmem>>, vector<1x1x128xf32>
    %287 = vector.shape_cast %286 : vector<1x1x128xf32> to vector<1x128xf32>
    %288 = vector.broadcast %287 : vector<1x128xf32> to vector<8x128xf32>
    %289 = arith.addf %285, %288 : vector<8x128xf32>
    %cst_105 = arith.constant 0.000000e+00 : f32
    %290 = vector.broadcast %cst_105 : f32 to vector<8x128xf32>
    %291 = arith.maximumf %289, %290 : vector<8x128xf32>
    %292 = arith.truncf %291 : vector<8x128xf32> to vector<8x128xbf16>
    %c0_106 = arith.constant 0 : index
    %c0_107 = arith.constant 0 : index
    %c0_108 = arith.constant 0 : index
    %293 = vector.load %arg20[%c0_106, %c0_107, %c0_108] : memref<1x128x32xbf16, #tpu.memory_space<vmem>>, vector<1x128x32xbf16>
    %294 = vector.shape_cast %293 : vector<1x128x32xbf16> to vector<128x32xbf16>
    %cst_109 = arith.constant dense<0.000000e+00> : vector<8x32xf32>
    %295 = tpu.matmul %292, %294, %cst_109 {dimension_numbers = #tpu.dot_dimension_numbers<[1], [0], [0], [1], [0, 0, 1, 1], [], []>} : vector<8x128xbf16>, vector<128x32xbf16>, vector<8x32xf32> -> vector<8x32xf32>
    %c0_110 = arith.constant 0 : index
    %c0_111 = arith.constant 0 : index
    %c0_112 = arith.constant 0 : index
    %296 = vector.load %arg21[%c0_110, %c0_111, %c0_112] : memref<1x1x32xf32, #tpu.memory_space<vmem>>, vector<1x1x32xf32>
    %297 = vector.shape_cast %296 : vector<1x1x32xf32> to vector<1x32xf32>
    %298 = vector.broadcast %297 : vector<1x32xf32> to vector<8x32xf32>
    %299 = arith.addf %295, %298 : vector<8x32xf32>
    %300 = arith.addf %281, %299 : vector<8x32xf32>
    %c0_113 = arith.constant 0 : index
    %c0_114 = arith.constant 0 : index
    %c0_115 = arith.constant 0 : index
    %301 = vector.load %arg22[%c0_113, %c0_114, %c0_115] : memref<1x1x32xf32, #tpu.memory_space<vmem>>, vector<1x1x32xf32>
    %302 = vector.shape_cast %301 : vector<1x1x32xf32> to vector<1x32xf32>
    %c0_116 = arith.constant 0 : index
    %c0_117 = arith.constant 0 : index
    %c0_118 = arith.constant 0 : index
    %303 = vector.load %arg23[%c0_116, %c0_117, %c0_118] : memref<1x1x32xf32, #tpu.memory_space<vmem>>, vector<1x1x32xf32>
    %304 = vector.shape_cast %303 : vector<1x1x32xf32> to vector<1x32xf32>
    %cst_119 = arith.constant dense<0.000000e+00> : vector<8xf32>
    %305 = vector.multi_reduction <add>, %300, %cst_119 [1] : vector<8x32xf32> to vector<8xf32>
    %306 = vector.shape_cast %305 : vector<8xf32> to vector<8x1xf32>
    %cst_120 = arith.constant 3.200000e+01 : f32
    %307 = vector.broadcast %cst_120 : f32 to vector<8x1xf32>
    %308 = arith.divf %306, %307 : vector<8x1xf32>
    %309 = vector.broadcast %308 : vector<8x1xf32> to vector<8x32xf32>
    %310 = arith.subf %300, %309 : vector<8x32xf32>
    %311 = arith.mulf %310, %310 : vector<8x32xf32>
    %cst_121 = arith.constant dense<0.000000e+00> : vector<8xf32>
    %312 = vector.multi_reduction <add>, %311, %cst_121 [1] : vector<8x32xf32> to vector<8xf32>
    %313 = vector.shape_cast %312 : vector<8xf32> to vector<8x1xf32>
    %cst_122 = arith.constant 3.200000e+01 : f32
    %314 = vector.broadcast %cst_122 : f32 to vector<8x1xf32>
    %315 = arith.divf %313, %314 : vector<8x1xf32>
    %316 = vector.broadcast %308 : vector<8x1xf32> to vector<8x32xf32>
    %317 = arith.subf %300, %316 : vector<8x32xf32>
    %cst_123 = arith.constant 9.99999974E-6 : f32
    %318 = vector.broadcast %cst_123 : f32 to vector<8x1xf32>
    %319 = arith.addf %315, %318 : vector<8x1xf32>
    %320 = math.rsqrt %319 : vector<8x1xf32>
    %321 = vector.broadcast %320 : vector<8x1xf32> to vector<8x32xf32>
    %322 = arith.mulf %317, %321 : vector<8x32xf32>
    %323 = vector.broadcast %302 : vector<1x32xf32> to vector<8x32xf32>
    %324 = arith.mulf %322, %323 : vector<8x32xf32>
    %325 = vector.broadcast %304 : vector<1x32xf32> to vector<8x32xf32>
    %326 = arith.addf %324, %325 : vector<8x32xf32>
    %327 = vector.shape_cast %326 : vector<8x32xf32> to vector<1x8x32xf32>
    %c0_124 = arith.constant 0 : index
    %c0_125 = arith.constant 0 : index
    %c0_126 = arith.constant 0 : index
    %328 = vector.load %arg25[%c0_124, %c0_125, %c0_126] : memref<1x8x32xf32, #tpu.memory_space<vmem>>, vector<1x8x32xf32>
    tpu.vector_store %arg25[%c0_124, %c0_125, %c0_126], %327 {strides = array<i32>} : memref<1x8x32xf32, #tpu.memory_space<vmem>>, vector<1x8x32xf32>,
    %c2_i32 = arith.constant 2 : i32
    %329 = arith.cmpi eq, %arg1, %c2_i32 : i32
    %330 = arith.extui %329 : i1 to i32
    %c0_i32_127 = arith.constant 0 : i32
    %331 = arith.cmpi ne, %330, %c0_i32_127 : i32
    scf.if %331 {
      %332 = vector.shape_cast %326 : vector<8x32xf32> to vector<1x8x32xf32>
      %333 = arith.truncf %332 : vector<1x8x32xf32> to vector<1x8x32xbf16>
      %c0_128 = arith.constant 0 : index
      %c0_129 = arith.constant 0 : index
      %c0_130 = arith.constant 0 : index
      %334 = vector.load %arg24[%c0_128, %c0_129, %c0_130] : memref<1x8x32xbf16, #tpu.memory_space<vmem>>, vector<1x8x32xbf16>
      tpu.vector_store %arg24[%c0_128, %c0_129, %c0_130], %333 {strides = array<i32>} : memref<1x8x32xbf16, #tpu.memory_space<vmem>>, vector<1x8x32xbf16>,
    } else {
    }
    return
  }
  func.func @transform_0(%arg0: i32, %arg1: i32) -> (i32, i32, i32) {
    %c0_i32 = arith.constant 0 : i32
    %c0_i32_0 = arith.constant 0 : i32
    %c0_i32_1 = arith.constant 0 : i32
    return %arg0, %c0_i32, %c0_i32_0 : i32, i32, i32
  }
  func.func @transform_1(%arg0: i32, %arg1: i32) -> (i32, i32, i32) {
    %c0_i32 = arith.constant 0 : i32
    %c0_i32_0 = arith.constant 0 : i32
    %c0_i32_1 = arith.constant 0 : i32
    return %arg0, %c0_i32, %c0_i32_0 : i32, i32, i32
  }
  func.func @transform_2(%arg0: i32, %arg1: i32) -> (i32, i32, i32) {
    %c0_i32 = arith.constant 0 : i32
    %c0_i32_0 = arith.constant 0 : i32
    %c0_i32_1 = arith.constant 0 : i32
    return %arg1, %c0_i32, %c0_i32_0 : i32, i32, i32
  }
  func.func @transform_3(%arg0: i32, %arg1: i32) -> (i32, i32, i32) {
    %c0_i32 = arith.constant 0 : i32
    %c0_i32_0 = arith.constant 0 : i32
    %c0_i32_1 = arith.constant 0 : i32
    return %arg1, %c0_i32, %c0_i32_0 : i32, i32, i32
  }
  func.func @transform_4(%arg0: i32, %arg1: i32) -> (i32, i32, i32) {
    %c0_i32 = arith.constant 0 : i32
    %c0_i32_0 = arith.constant 0 : i32
    %c0_i32_1 = arith.constant 0 : i32
    return %arg1, %c0_i32, %c0_i32_0 : i32, i32, i32
  }
  func.func @transform_5(%arg0: i32, %arg1: i32) -> (i32, i32, i32) {
    %c0_i32 = arith.constant 0 : i32
    %c0_i32_0 = arith.constant 0 : i32
    %c0_i32_1 = arith.constant 0 : i32
    return %arg1, %c0_i32, %c0_i32_0 : i32, i32, i32
  }
  func.func @transform_6(%arg0: i32, %arg1: i32) -> (i32, i32, i32) {
    %c0_i32 = arith.constant 0 : i32
    %c0_i32_0 = arith.constant 0 : i32
    %c0_i32_1 = arith.constant 0 : i32
    return %arg1, %c0_i32, %c0_i32_0 : i32, i32, i32
  }
  func.func @transform_7(%arg0: i32, %arg1: i32) -> (i32, i32, i32) {
    %c0_i32 = arith.constant 0 : i32
    %c0_i32_0 = arith.constant 0 : i32
    %c0_i32_1 = arith.constant 0 : i32
    return %arg1, %c0_i32, %c0_i32_0 : i32, i32, i32
  }
  func.func @transform_8(%arg0: i32, %arg1: i32) -> (i32, i32, i32) {
    %c0_i32 = arith.constant 0 : i32
    %c0_i32_0 = arith.constant 0 : i32
    %c0_i32_1 = arith.constant 0 : i32
    return %arg1, %c0_i32, %c0_i32_0 : i32, i32, i32
  }
  func.func @transform_9(%arg0: i32, %arg1: i32) -> (i32, i32, i32) {
    %c0_i32 = arith.constant 0 : i32
    %c0_i32_0 = arith.constant 0 : i32
    %c0_i32_1 = arith.constant 0 : i32
    return %arg1, %c0_i32, %c0_i32_0 : i32, i32, i32
  }
  func.func @transform_10(%arg0: i32, %arg1: i32) -> (i32, i32, i32) {
    %c0_i32 = arith.constant 0 : i32
    %c0_i32_0 = arith.constant 0 : i32
    %c0_i32_1 = arith.constant 0 : i32
    return %arg1, %c0_i32, %c0_i32_0 : i32, i32, i32
  }
  func.func @transform_11(%arg0: i32, %arg1: i32) -> (i32, i32, i32) {
    %c0_i32 = arith.constant 0 : i32
    %c0_i32_0 = arith.constant 0 : i32
    %c0_i32_1 = arith.constant 0 : i32
    return %arg1, %c0_i32, %c0_i32_0 : i32, i32, i32
  }
  func.func @transform_12(%arg0: i32, %arg1: i32) -> (i32, i32, i32) {
    %c0_i32 = arith.constant 0 : i32
    %c0_i32_0 = arith.constant 0 : i32
    %c0_i32_1 = arith.constant 0 : i32
    return %arg1, %c0_i32, %c0_i32_0 : i32, i32, i32
  }
  func.func @transform_13(%arg0: i32, %arg1: i32) -> (i32, i32, i32) {
    %c0_i32 = arith.constant 0 : i32
    %c0_i32_0 = arith.constant 0 : i32
    %c0_i32_1 = arith.constant 0 : i32
    return %arg1, %c0_i32, %c0_i32_0 : i32, i32, i32
  }
  func.func @transform_14(%arg0: i32, %arg1: i32) -> (i32, i32, i32) {
    %c0_i32 = arith.constant 0 : i32
    %c0_i32_0 = arith.constant 0 : i32
    %c0_i32_1 = arith.constant 0 : i32
    return %arg1, %c0_i32, %c0_i32_0 : i32, i32, i32
  }
  func.func @transform_15(%arg0: i32, %arg1: i32) -> (i32, i32, i32) {
    %c0_i32 = arith.constant 0 : i32
    %c0_i32_0 = arith.constant 0 : i32
    %c0_i32_1 = arith.constant 0 : i32
    return %arg1, %c0_i32, %c0_i32_0 : i32, i32, i32
  }
  func.func @transform_16(%arg0: i32, %arg1: i32) -> (i32, i32, i32) {
    %c0_i32 = arith.constant 0 : i32
    %c0_i32_0 = arith.constant 0 : i32
    %c0_i32_1 = arith.constant 0 : i32
    return %arg1, %c0_i32, %c0_i32_0 : i32, i32, i32
  }
  func.func @transform_17(%arg0: i32, %arg1: i32) -> (i32, i32, i32) {
    %c0_i32 = arith.constant 0 : i32
    %c0_i32_0 = arith.constant 0 : i32
    %c0_i32_1 = arith.constant 0 : i32
    return %arg1, %c0_i32, %c0_i32_0 : i32, i32, i32
  }
  func.func @transform_18(%arg0: i32, %arg1: i32) -> (i32, i32, i32) {
    %c0_i32 = arith.constant 0 : i32
    %c0_i32_0 = arith.constant 0 : i32
    %c0_i32_1 = arith.constant 0 : i32
    return %arg1, %c0_i32, %c0_i32_0 : i32, i32, i32
  }
  func.func @transform_19(%arg0: i32, %arg1: i32) -> (i32, i32, i32) {
    %c0_i32 = arith.constant 0 : i32
    %c0_i32_0 = arith.constant 0 : i32
    %c0_i32_1 = arith.constant 0 : i32
    return %arg1, %c0_i32, %c0_i32_0 : i32, i32, i32
  }
  func.func @transform_20(%arg0: i32, %arg1: i32) -> (i32, i32, i32) {
    %c0_i32 = arith.constant 0 : i32
    %c0_i32_0 = arith.constant 0 : i32
    %c0_i32_1 = arith.constant 0 : i32
    return %arg1, %c0_i32, %c0_i32_0 : i32, i32, i32
  }
  func.func @transform_21(%arg0: i32, %arg1: i32) -> (i32, i32, i32) {
    %c0_i32 = arith.constant 0 : i32
    %c0_i32_0 = arith.constant 0 : i32
    %c0_i32_1 = arith.constant 0 : i32
    return %arg1, %c0_i32, %c0_i32_0 : i32, i32, i32
  }
  func.func @transform_22(%arg0: i32, %arg1: i32) -> (i32, i32, i32) {
    %c0_i32 = arith.constant 0 : i32
    %c0_i32_0 = arith.constant 0 : i32
    %c0_i32_1 = arith.constant 0 : i32
    return %arg0, %c0_i32, %c0_i32_0 : i32, i32, i32
  }
}

</mosaic_0001>

<bundles_post_ra>
// kernel: tpu_custom_call.1
= control target key start
LH: loop header
LB: loop body
LE: loop exit
PB: predicated region body
PF: predicated region fallthrough
CT: control target
= control target key end

     0   :  { %s4587_s0 = inlined_call_operand.hbm [shape: f32[2,8,32], index: 0, kind: input, shape index: {}]   ;;  %s4588_s1 = inlined_call_operand.hbm [shape: f32[2,16,32], index: 1, kind: input, shape index: {}]   ;;  %s4589_s2 = inlined_call_operand.vmem [shape: bf16[3,32,96], index: 2, kind: input, shape index: {}]   ;;  %s4590_s3 = inlined_call_operand.vmem [shape: f32[3,1,96], index: 3, kind: input, shape index: {}]   ;;  %s4591_s4 = inlined_call_operand.vmem [shape: bf16[3,32,32], index: 4, kind: input, shape index: {}]   ;;  %s4592_s5 = inlined_call_operand.vmem [shape: f32[3,1,32], index: 5, kind: input, shape index: {}]   ;;  %s4593_s6 = inlined_call_operand.vmem [shape: f32[3,1,32], index: 6, kind: input, shape index: {}]   ;;  %s4594_s7 = inlined_call_operand.hbm [shape: f32[3,1,32], index: 7, kind: input, shape index: {}]   ;;  %s4595_s8 = inlined_call_operand.vmem [shape: bf16[3,32,32], index: 8, kind: input, shape index: {}]   ;;  %s4596_s9 = inlined_call_operand.vmem [shape: f32[3,1,32], index: 9, kind: input, shape index: {}]   ;;  %s4597_s10 = inlined_call_operand.vmem [shape: bf16[3,32,64], index: 10, kind: input, shape index: {}]   ;;  %s4598_s11 = inlined_call_operand.vmem [shape: f32[3,1,64], index: 11, kind: input, shape index: {}]   ;;  %s4599_s12 = inlined_call_operand.vmem [shape: bf16[3,32,32], index: 12, kind: input, shape index: {}]   ;;  %s4600_s13 = inlined_call_operand.vmem [shape: f32[3,1,32], index: 13, kind: input, shape index: {}]   ;;  %s4601_s14 = inlined_call_operand.vmem [shape: f32[3,1,32], index: 14, kind: input, shape index: {}]   ;;  %s4602_s15 = inlined_call_operand.vmem [shape: f32[3,1,32], index: 15, kind: input, shape index: {}]   ;;  %s4603_s16 = inlined_call_operand.hbm [shape: bf16[3,32,128], index: 16, kind: input, shape index: {}]   ;;  %s4604_s17 = inlined_call_operand.vmem [shape: f32[3,1,128], index: 17, kind: input, shape index: {}]   ;;  %s4605_s18 = inlined_call_operand.vmem [shape: bf16[3,128,32], index: 18, kind: input, shape index: {}]   ;;  %s4606_s19 = inlined_call_operand.vmem [shape: f32[3,1,32], index: 19, kind: input, shape index: {}]   ;;  %s4607_s20 = inlined_call_operand.vmem [shape: f32[3,1,32], index: 20, kind: input, shape index: {}]   ;;  %s4608_s21 = inlined_call_operand.vmem [shape: f32[3,1,32], index: 21, kind: input, shape index: {}]   ;;  %s4609_s22 = inlined_call_operand.hbm [shape: bf16[2,8,32], index: 22, kind: output, shape index: {}]  }
   0x1   :  { %4629 = sst [smem:[#allocation35_spill]] %s4587_s0 }
   0x2   :  { %4630 = sst [smem:[#allocation36_spill]] %s4588_s1 }
   0x3   :  { %4631 = sst [smem:[#allocation37_spill]] %s4589_s2 }
   0x4   :  { %4632 = sst [smem:[#allocation38_spill]] %s4590_s3 }
   0x5   :  { %4633 = sst [smem:[#allocation39_spill]] %s4591_s4 }
   0x6   :  { %4634 = sst [smem:[#allocation40_spill]] %s4592_s5 }
   0x7   :  { %4635 = sst [smem:[#allocation41_spill]] %s4593_s6 }
   0x8   :  { %4636 = sst [smem:[#allocation42_spill]] %s4594_s7 }
   0x9   :  { %4637 = sst [smem:[#allocation43_spill]] %s4595_s8 }
   0xa   :  { %4638 = sst [smem:[#allocation44_spill]] %s4596_s9 }
   0xb   :  { %4639 = sst [smem:[#allocation45_spill]] %s4597_s10 }
   0xc   :  { %4640 = sst [smem:[#allocation46_spill]] %s4598_s11 }
   0xd   :  { %4641 = sst [smem:[#allocation47_spill]] %s4599_s12 }
   0xe   :  { %4642 = sst [smem:[#allocation48_spill]] %s4600_s13 }
   0xf   :  { %4643 = sst [smem:[#allocation49_spill]] %s4601_s14 }
  0x10   :  { %4644 = sst [smem:[#allocation50_spill]] %s4602_s15 }
  0x11   :  { %4645 = sst [smem:[#allocation51_spill]] %s4603_s16 }
  0x12   :  { %4646 = sst [smem:[#allocation52_spill]] %s4604_s17 }
  0x13   :  { %4647 = sst [smem:[#allocation53_spill]] %s4605_s18 }
  0x14   :  { %4648 = sst [smem:[#allocation54_spill]] %s4606_s19 }
  0x15   :  { %4649 = sst [smem:[#allocation55_spill]] %s4607_s20 }
  0x16   :  { %4650 = sst [smem:[#allocation56_spill]] %s4608_s21 }
  0x17   :  { %4651 = sst [smem:[#allocation57_spill]] %s4609_s22 }
  0x18   :  { %27 = vsyncpa [#allocation4], 0 }
  0x19   :  { %29 = vsyncpa [#allocation4 + $0x1], 0 }
  0x1a   :  { %30 = vsyncpa [#allocation7], 0 }
  0x1b   :  { %32 = vsyncpa [#allocation7 + $0x1], 0 }
  0x1c   :  { %33 = vsyncpa [#allocation10], 0 }
  0x1d   :  { %35 = vsyncpa [#allocation10 + $0x1], 0 }
  0x1e   :  { %36 = vsyncpa [#allocation5], 0 }
  0x1f   :  { %38 = vsyncpa [#allocation5 + $0x1], 0  ;;  %s3900_s3 = smov 0   ;;  %s3902_s28 = smov 0  }
  0x20   :  { %s3904_s29 = smov 0   ;;  %s3906_s30 = smov 0  }
  0x21   :  { %s3908_s4 = smov 0   ;;  %s3910_s0 = smov 0  }
  0x22   :  { %s3912_s23 = smov 0   ;;  %s3914_s1 = smov 0  }
  0x23   :  { %s3916_s5 = smov 0   ;;  %s3918_s24 = smov 0  }
  0x24   :  { %s3920_s6 = smov 0  }
  0x25 LB: > { %4652 = sst [smem:[#allocation17_spill]] %s3721_s28  ;;  %s3956_s25 = sadd.s32 4294967295, %s3757_s6   ;;  %s3757_s6 = sphi %s3920_s6, %s44_s6   ;;  %s3753_s24 = sphi %s3918_s24, %s4742_s24   ;;  %s3749_s5 = sphi %s3916_s5, %s4741_s5   ;;  %s3745_s1 = sphi %s3914_s1, %s4740_s1   ;;  %s3741_s23 = sphi %s3912_s23, %s4739_s23   ;;  %s3737_s0 = sphi %s3910_s0, %s4738_s0   ;;  %s3733_s4 = sphi %s3908_s4, %s4737_s4   ;;  %s3729_s30 = sphi %s3906_s30, %s4736_s30   ;;  %s3725_s29 = sphi %s3904_s29, %s4735_s29   ;;  %s3721_s28 = sphi %s3902_s28, %s4734_s28   ;;  %s3717_s3 = sphi %s3900_s3, %s4733_s3  }
  0x26   : > { %4653 = sst [smem:[#allocation18_spill]] %s3725_s29  ;;  %s2996_s26 = sadd.s32 4294967294, %s3757_s6  }
  0x27   : > { %4654 = sst [smem:[#allocation19_spill]] %s3729_s30  ;;  %p70_p0 = scmp.ne.s32.totalorder %s3737_s0, %s3733_s4 }
  0x28   : > { %4655 = sst [smem:[#allocation20_spill]] %s3733_s4  ;;  %p71_p1 = scmp.eq.s32.totalorder %s3757_s6, 0 }
  0x29   : > { %4656 = sst [smem:[#allocation21_spill]] %s3737_s0  ;;  %p76_p2 = scmp.ne.s32.totalorder %s3733_s4, %s3729_s30 }
  0x2a   : > { %4657 = sst [smem:[#allocation22_spill]] %s3745_s1  ;;  %p646_p3 = scmp.eq.s32.totalorder %s3956_s25, 5 }
  0x2b   : > { %4658 = sst [smem:[#allocation23_spill]] %s3749_s5  ;;  %p72_p4 = por %p71_p1, %p70_p0 }
  0x2c   : > { %4659 = sst [smem:[#allocation24_spill]] %s3753_s24  ;;  %p652_p5 = scmp.eq.s32.totalorder %s2996_s26, 5 }
  0x2d   : > { %4660 = sst [smem:[#allocation25_spill]] %s3757_s6  ;;  %p3969_p6 = por %p646_p3, %p70_p0 }
  0x2e   : > { %p3976_p7 = por %p652_p5, %p76_p2  ;;  %p4614_p8 = scmp.lt.s32.totalorder %s3757_s6, 6 }
  0x2f   : > { %s4661_s22 = scalar_select %p3969_p6, 1, 0 }
  0x30   : > { %s4663_s1 = scalar_select %p3976_p7, 1, 0 }
  0x31   : > { %4662 = sst [smem:[#allocation26_spill]] %s4661_s22  ;;  %s3982_s2 = sand.u32 1, %s3737_s0  }
  0x32   : > { %4664 = sst [smem:[#allocation27_spill]] %s4663_s1  ;;  %s690_s27 = sand.u32 1, %s3757_s6  }
  0x33   : > { %p3987_p9 = pnand %p4614_p8, %p72_p4  ;;  %s3001_s26 = sshll.u32 %s3982_s2, 4 }
  0x34   : > { %s3086_s20 = sshll.u32 %s3753_s24, 8  ;;  %s4666_s18 = sld [smem:[#allocation36_spill]] }
  0x35   : > { %s694_s15 = scalar_lea.vmem [#allocation6], %s3001_s26  ;;  %p3008_p10 = scmp.ge.s32.totalorder %s3757_s6, 1 }
  0x36   : > { %s701_s1 = sshll.u32 %s694_s15, 4  ;;  %s3997_s14 = scalar_lea.sflag [#allocation7], %s690_s27  ;;  %s702_s1 = int_to_ptr.vmem [resolvable:$true] %s701_s1 }
  0x37   : > { %p3515_p11 = pneg %p3987_p9  ;;  %s3526_s13 = scalar_lea.vmem %s702_s1, 256 }
  0x38   : > { %p3527_p12 = scmp.ne.s32.totalorder %s702_s1, %s3526_s13  ;;  %s3759_s12 = smov [#allocation6]  }
  0x39   : > { %s3531_s11 = sshll.u32 %s3759_s12, 4  ;;  %s3532_s11 = int_to_ptr.vmem [resolvable:$false] %s3531_s11 }
  0x3a   : > { %s700_s17 = scalar_lea.hbm %s4666_s18, %s3086_s20  ;;  %p3529_p13 = pnand %p3527_p12, %p3515_p11 }
  0x3b   : > { %s3533_s10 = scalar_lea.vmem %s3532_s11, 512  ;;  %p3534_p3 = scmp.lt.s32.totalorder %s702_s1, %s3532_s11 }
  0x3c   : > { %p3530_p0 = pneg %p3529_p13  ;;  %p3535_p4 = scmp.lt.s32.totalorder %s3533_s10, %s3526_s13 }
  0x3e   : > { %p3536_p5 = por %p3535_p4, %p3534_p3 }
  0x40   : > { %p3537_p8 = pnand %p3536_p5, %p3530_p0 }
  0x42   : > { %3540 = shalt.err (!%p3537_p8)
}
  0x43   : > { %s3760_s15 = smov 128   ;;  %s3761_s18 = smov 8  }
  0x44   : > { %3333 = dma.hbm_to_vmem [thread:$0]  (!%p3987_p9), %s700_s17, 256, %s702_s1, %s3997_s14, %s3760_s15, %s3760_s15, %s3761_s18  }
  0x45   : > { %p867_p12 = scmp.lt.s32.totalorder %s3757_s6, 7  ;;  %s2999_s10 = sshll.u32 %s3982_s2, 3 }
  0x46   : > { %s3000_s12 = sshll.u32 %s3753_s24, 7  ;;  %s4668_s20 = sld [smem:[#allocation35_spill]] }
  0x47   : > { %p4010_p13 = pnand %p3008_p10, %p867_p12  ;;  %s676_s27 = scalar_lea.vmem [#allocation3], %s2999_s10 }
  0x48   : > { %s683_s26 = sshll.u32 %s676_s27, 4  ;;  %s673_s9 = scalar_lea.sflag [#allocation4], %s3982_s2  ;;  %s684_s26 = int_to_ptr.vmem [resolvable:$true] %s683_s26 }
  0x49   : > { %s3554_s8 = scalar_lea.vmem %s684_s26, 128  ;;  %s3762_s17 = smov [#allocation3]  }
  0x4a   : > { %p3555_p8 = scmp.ne.s32.totalorder %s684_s26, %s3554_s8  ;;  %s3559_s1 = sshll.u32 %s3762_s17, 4  ;;  %s3560_s1 = int_to_ptr.vmem [resolvable:$false] %s3559_s1 }
  0x4b   : > { %s3561_s15 = scalar_lea.vmem %s3560_s1, 256  ;;  %p3562_p10 = scmp.lt.s32.totalorder %s684_s26, %s3560_s1 }
  0x4c   : > { %s681_s22 = scalar_lea.hbm %s4668_s20, %s3000_s12  ;;  %p3557_p0 = pnand %p3555_p8, %p3515_p11 }
  0x4d   : > { %p3563_p4 = scmp.lt.s32.totalorder %s3561_s15, %s3554_s8 }
  0x4e   : > { %p3558_p3 = pneg %p3557_p0 }
  0x4f   : > { %p3564_p5 = por %p3563_p4, %p3562_p10 }
  0x51   : > { %p3565_p12 = pnand %p3564_p5, %p3558_p3 }
  0x53   : > { %3568 = shalt.err (!%p3565_p12)
}
  0x54   : > { %3330 = dma.hbm_to_vmem [thread:$0]  (!%p3987_p9), %s681_s22, 128, %s684_s26, %s673_s9  }
  0x55   : > { %s53_s8 = sadd.s32 1, %s3749_s5  ;;  %p77_p8 = scmp.eq.s32.totalorder %s3956_s25, 0 }
  0x56   : > { %p54_p11 = scmp.ge.s32.totalorder %s53_s8, 3  ;;  %s245_s21 = sadd.s32 1, %s3725_s29 }
  0x57   : > { %p252_p0 = scmp.ne.s32.totalorder %s3725_s29, %s3721_s28  ;;  %s4670_s2 = sadd.s32 1, %s3753_s24 }
  0x58   : > { %s4744_s8 = smov (%p54_p11, %s53_s8), 0  ;;  %s4746_s2 = smov (!%p54_p11, %s4670_s2), %s3753_s24 }
  0x59   : > { %4669 = sst [smem:[#allocation28_spill]] %s4744_s8  ;;  %p4040_p3 = por %p77_p8, %p76_p2 }
  0x5a   : > { %s242_s18 = ssub.s32 %s3749_s5, %s4744_s8  ;;  %p58_p9 = scmp.ge.s32.totalorder %s4746_s2, 2 }
  0x5b   : > { %p243_p10 = scmp.eq.s32.totalorder %s242_s18, 0  ;;  %p4048_p4 = por %p252_p0, %p71_p1 }
  0x5c   : > { %p258_p5 = scmp.ne.s32.totalorder %s3721_s28, %s3717_s3  ;;  %s4748_s2 = smov (%p58_p9, %s4746_s2), 0 }
  0x5d   : > { %4673 = sst [smem:[#allocation29_spill]] %s4748_s2  ;;  %s60_s13 = ssub.s32 %s3753_s24, %s4748_s2 }
  0x5e   : > { %s4057_s12 = scalar_select %p243_p10, %s3725_s29, %s245_s21  }
  0x5f   : > { %p4063_p2 = por %p258_p5, %p77_p8  ;;  %p61_p12 = scmp.eq.s32.totalorder %s60_s13, 0 }
  0x60   : > { %4674 = sst [smem:[#allocation30_spill]] %s4057_s12  ;;  %s4068_s20 = sand.u32 1, %s3725_s29  }
  0x61   : > { %s3004_s22 = sshll.u32 %s3749_s5, 4  ;;  %s4676_s27 = sadd.s32 1, %s3737_s0 }
  0x62   : > { %s4074_s26 = scalar_select %p61_p12, %s3737_s0, %s4676_s27  }
  0x63   : > { %s4678_s7 = sld [smem:[#allocation42_spill]]  ;;  %s748_s15 = scalar_lea.vmem [#allocation8], %s4068_s20 }
  0x64   : > { %4677 = sst [smem:[#allocation31_spill]] %s4074_s26  ;;  %s755_s21 = sshll.u32 %s748_s15, 4  ;;  %s756_s21 = int_to_ptr.vmem [resolvable:$true] %s755_s21 }
  0x65   : > { %p4679_p1 = scmp.lt.s32.totalorder %s3757_s6, 6  ;;  %s3005_s13 = sshll.u32 %s4068_s20, 4 }
  0x66   : > { %s3582_s27 = scalar_lea.vmem %s756_s21, 16 }
  0x67   : > { %p4084_p11 = pnand %p4679_p1, %p4048_p4  ;;  %p3583_p0 = scmp.ne.s32.totalorder %s756_s21, %s3582_s27 }
  0x69   : > { %s753_s1 = scalar_lea.hbm %s4678_s7, %s3004_s22  ;;  %p3571_p8 = pneg %p4084_p11 }
  0x6a   : > { %s3763_s22 = smov [#allocation8]  }
  0x6b   : > { %p3585_p9 = pnand %p3583_p0, %p3571_p8  ;;  %s3587_s3 = sshll.u32 %s3763_s22, 4  ;;  %s3588_s3 = int_to_ptr.vmem [resolvable:$false] %s3587_s3 }
  0x6c   : > { %s3589_s10 = scalar_lea.vmem %s3588_s3, 32  ;;  %p3590_p5 = scmp.lt.s32.totalorder %s756_s21, %s3588_s3 }
  0x6d   : > { %p3586_p10 = pneg %p3585_p9  ;;  %p3591_p4 = scmp.lt.s32.totalorder %s3589_s10, %s3582_s27 }
  0x6f   : > { %p3592_p12 = por %p3591_p4, %p3590_p5 }
  0x71   : > { %p3593_p1 = pnand %p3592_p12, %p3586_p10 }
  0x73   : > { %3596 = shalt.err (!%p3593_p1)
}
  0x74   : > { %3336 = dma.hbm_to_vmem [thread:$0]  (!%p4084_p11), %s753_s1, 16, %s756_s21, %s3997_s14  }
  0x75   : > { %s3087_s17 = sshll.u32 %s3749_s5, 8  ;;  %s820_s15 = scalar_lea.vmem [#allocation9], %s3005_s13 }
  0x76   : > { %s827_s7 = sshll.u32 %s820_s15, 4  ;;  %s4681_s16 = sld [smem:[#allocation51_spill]]  ;;  %s828_s7 = int_to_ptr.vmem [resolvable:$true] %s827_s7 }
  0x77   : > { %s817_s3 = scalar_lea.sflag [#allocation10], %s4068_s20  ;;  %s3610_s27 = scalar_lea.vmem %s828_s7, 256 }
  0x78   : > { %p3611_p0 = scmp.ne.s32.totalorder %s828_s7, %s3610_s27  ;;  %s3764_s10 = smov [#allocation9]  }
  0x79   : > { %s3615_s24 = sshll.u32 %s3764_s10, 4  ;;  %s3616_s24 = int_to_ptr.vmem [resolvable:$false] %s3615_s24 }
  0x7a   : > { %p3613_p9 = pnand %p3611_p0, %p3571_p8  ;;  %s3617_s26 = scalar_lea.vmem %s3616_s24, 512 }
  0x7b   : > { %p3618_p5 = scmp.lt.s32.totalorder %s828_s7, %s3616_s24  ;;  %p3619_p4 = scmp.lt.s32.totalorder %s3617_s26, %s3610_s27 }
  0x7c   : > { %s826_s22 = scalar_lea.hbm %s4681_s16, %s3087_s17  ;;  %p3614_p10 = pneg %p3613_p9 }
  0x7d   : > { %p3620_p12 = por %p3619_p4, %p3618_p5 }
  0x7f   : > { %p3621_p1 = pnand %p3620_p12, %p3614_p10 }
  0x81   : > { %3624 = shalt.err (!%p3621_p1)
}
  0x82   : > { %s3765_s14 = smov 64   ;;  %s3766_s8 = smov 4  }
  0x83   : > { %3339 = dma.hbm_to_vmem [thread:$0]  (!%p4084_p11), %s826_s22, 256, %s828_s7, %s817_s3, %s3765_s14, %s3765_s14, %s3766_s8  }
  0x84   : > { %871 = sbr.rel (%p4010_p13) target bundleno = 4798 (0x12be), region = 108 }
  0x89   : > { %s4110_s2 = sand.u32 1, %s3733_s4  }
  0x8a   : > { %4682 = sst [smem:[#allocation32_spill]] %s4110_s2  ;;  %s3009_s20 = sshll.u32 %s4110_s2, 3 }
  0x8b   : > { %s874_s24 = scalar_lea.sflag [#allocation4], %s4110_s2  ;;  %s4114_s26 = scalar_lea.vmem [#allocation3], %s3009_s20 }
  0x8c   : > { %3696 = dma.done.wait (%p4040_p3), %s874_s24, 128  }
  0x8d   : > { %3698 = vsyncadd (%p4040_p3), %s874_s24, 4294967168  ;;  %s882_s7 = sand.u32 1, %s3956_s25   ;;  %s3010_s11 = sshll.u32 %s4110_s2, 4 }
  0x8e   : > { %s883_s1 = scalar_lea.sflag [#allocation7], %s882_s7  ;;  %s4122_s21 = scalar_lea.vmem [#allocation6], %s3010_s11 }
  0x8f   : > { %3700 = dma.done.wait (%p4040_p3), %s883_s1, 256  }
  0x90   : > { %3702 = vsyncadd (%p4040_p3), %s883_s1, 4294967040  ;;  %s4129_s18 = sand.u32 1, %s3721_s28  }
  0x91   : > { %4683 = sst [smem:[#allocation33_spill]] %s4129_s18 }
  0x92   : > { %3704 = dma.done.wait (%p4063_p2), %s883_s1, 16  }
  0x93   : > { %3706 = vsyncadd (%p4063_p2), %s883_s1, 4294967280  ;;  %s3011_s25 = sshll.u32 %s4129_s18, 4  ;;  %s900_s17 = scalar_lea.sflag [#allocation10], %s4129_s18 }
  0x94   : > { %s4138_s15 = scalar_lea.vmem [#allocation9], %s3011_s25 }
  0x95   : > { %4684 = sst [smem:[#allocation34_spill]] %s4138_s15 }
  0x96   : > { %3708 = dma.done.wait (%p4063_p2), %s900_s17, 256  }
  0x97   : > { %3710 = vsyncadd (%p4063_p2), %s900_s17, 4294967040  ;;  %s3012_s9 = sshll.u32 %s4110_s2, 2  ;;  %p1044_p13 = scmp.lt.s32.totalorder %s3741_s23, 2 }
  0x98   : > { %s4686_s24 = sld [smem:[#allocation37_spill]]  ;;  %s4227_s18 = scalar_lea.vmem [#allocation11], %s3012_s9 }
  0x99   : > { %s4147_s22 = scalar_select %p1044_p13, %s3741_s23, 2 }
  0x9a   : > { %s4687_s25 = sld [smem:[#allocation39_spill]]  ;;  %p3025_p3 = scmp.ne.s32.totalorder %s3741_s23, 0 }
  0x9b   : > { %s3088_s19 = sshll.u32 %s4147_s22, 4  ;;  %s4690_s8 = sld [smem:[#allocation43_spill]] }
  0x9c   : > { %s4692_s30 = sld [smem:[#allocation45_spill]]  ;;  %s3093_s0 = sshll.u32 %s4147_s22, 6 }
  0x9d   : > { %s4694_s3 = sld [smem:[#allocation47_spill]] }
  0x9e   : > { %s1048_s7 = scalar_lea.vmem %s4686_s24, %s3088_s19  ;;  %s4698_s5 = sld [smem:[#allocation52_spill]] }
  0x9f   : > { %s4699_s12 = sld [smem:[#allocation53_spill]] }
  0xa0   : > { %s4160_s17 = scalar_lea.vmem %s4687_s25, %s3088_s19  ;;  %s4701_s11 = sld [smem:[#allocation55_spill]] }
  0xa1   : > { %s4173_s20 = scalar_lea.vmem %s4690_s8, %s3088_s19  ;;  %s4700_s8 = sld [smem:[#allocation54_spill]] }
  0xa2   : > { %s4182_s6 = scalar_lea.vmem %s4692_s30, %s3088_s19  ;;  %s4702_s25 = sld [smem:[#allocation56_spill]] }
  0xa3   : > { %s4191_s27 = scalar_lea.vmem %s4694_s3, %s3088_s19 }
  0xa4   : > { %s1095_s13 = scalar_lea.vmem %s4698_s5, %s4147_s22  ;;  %1114 = sbr.rel (%p3025_p3) target bundleno = 171 (0xab), region = 128 }
  0xa5   : > { %s4213_s3 = scalar_lea.vmem %s4699_s12, %s3093_s0 }
  0xa6   : > { %s1106_s1 = scalar_lea.vmem %s4701_s11, %s4147_s22 }
  0xa7   : > { %s1103_s2 = scalar_lea.vmem %s4700_s8, %s4147_s22 }
  0xa8   : > { %s1109_s15 = scalar_lea.vmem %s4702_s25, %s4147_s22 }
  0xa9   : > { %v1115_v0 = vld [vmem:[%s4114_s26] sm:$0xff]  ;;  %vm1116_vm0 = vcmask 261120  }
  0xaa   : > { %1117 = vst.msk [vmem:[#allocation2] sm:$0xff] %vm1116_vm0, %v1115_v0 }
  0xab PF: > { %v3455_v1 = vld [vmem:[%s1048_s7 + $0x8] sm:$0xff]   ;;  %v3767_v2 = vmov 0.0   ;;  %v3456_v3 = vld [vmem:[%s1048_s7] sm:$0xff]   ;;  %vm3768_vm1 = vmmov 0   ;;  %vm1153_vm2 = vcmask 261120   ;;  %s4703_s9 = sld [smem:[#allocation38_spill]]  ;;  %v1118_v17 = vlaneseq }
  0xac   : > { %3153 = vmatprep.subr.bf16.mxu1 %v3767_v2  ;;  %3179 = vmatprep.subr.bf16.mxu0 %v3767_v2  ;;  %s3769_s16 = smov 64   ;;  %s3770_s5 = smov 96   ;;  %vm1205_vm3 = vcmask 64512   ;;  %vm1269_vm4 = vcmask 1043456   ;;  %vm1659_vm6 = vcmask 130048   ;;  %vm1662_vm7 = vcmask 195584  }
  0xad   : > { %3154 = vmatpush3.bf16.msra.mxu1 %v3455_v1  ;;  %3157 = vmatprep.mubr.msk.bf16.mxu1 %vm3768_vm1, %v3767_v2  ;;  %s3771_s4 = smov 88   ;;  %v1119_v18 = vshrl.u32 %v1118_v17, 7  ;;  %v4266_v19 = vand.u32 127, %v1118_v17  ;;  %s3772_s19 = smov 72  }
  0xae   : > { %3155 = vmatprep.subr.bf16.mxu1 %v3767_v2  ;;  %3181 = vmatprep.mubr.msk.bf16.mxu0 %vm3768_vm1, %v3767_v2  ;;  %s3773_s12 = smov 120   ;;  %s3774_s14 = smov 80  }
  0xaf   : > { %vm1122_vm5 = vcmp.gt.s32.totalorder %v4266_v19, %v1119_v18  ;;  %s3775_s10 = smov 112   ;;  %s3776_s8 = smov 104   ;;  %vm1124_vm8 = vcmp.lt.s32.totalorder %v4266_v19, 10 }
  0xb0   : > { %v4270_v20 = vsel %vm1122_vm5, -1e+30, %v3767_v2  ;;  %s3777_s29 = smov 56   ;;  %s3778_s24 = smov 48  }
  0xb1   : > { %v4235_v4 = vld [vmem:[#allocation2] sm:$0xff]  ;;  %3156 = vmatpush3.bf16.msra.mxu1 %v3456_v3  ;;  %s4704_s7 = scalar_lea.vmem %s4703_s9, %s4147_s22  ;;  %s3779_s11 = smov 40  }
  0xb2   : > { %v1133_v5 = vpack.c.bf16 %v4235_v4, %v4235_v4  ;;  %3161 = vmatprep.subr.bf16.mxu1 %v3767_v2  ;;  %v3026_v6 = vld [vmem:[%s4704_s7] ss:$0 sm:$0xff]  ;;  %s3780_s28 = smov 8   ;;  %s3781_s30 = smov 16  }
  0xb3   : > { %s3782_s25 = smov 24   ;;  %s4705_s26 = sld [smem:[#allocation40_spill]] }
  0xb4   : > { %3158 = vmatmul.mubr.msk.bf16.vlgmr.msra.gmra.mxu1 %vm1153_vm2, %v1133_v5  ;;  %s4707_s7 = sld [smem:[#allocation33_spill]]  ;;  %p3081_p2 = scmp.ne.s32.totalorder %s3741_s23, 2 }
  0xb5   : > { %3163 = vmatprep.mubr.msk.bf16.mxu1 %vm3768_vm1, %v3767_v2 }
  0xb9   : > { %s4706_s9 = scalar_lea.vmem %s4705_s26, %s4147_s22 }
 0x174   : > { %v1191_v7 = vpop.f32.mrf.mxu1 }
 0x175   : > { %v1192_v8 = vadd.f32 %v3026_v6, %v1191_v7 }
 0x176   : > { %v3159_v9 = vpop.f32.mrf.mxu1 }
 0x177   : > { %v4251_v10 = vpack.c.bf16 %v1192_v8, %v1192_v8 }
 0x178   : > { %v1194_v11 = vpop.f32.mrf.mxu1 }
 0x179   : > { %1264 = vrot.lane.b32.xlu1 %v4251_v10, %s3769_s16  ;;  %1203 = vrot.lane.b32.xlu0 %v4251_v10, %s3770_s5  ;;  %s4708_s16 = sld [smem:[#allocation41_spill]] }
 0x17a   : > { %v3160_v12 = vpop.f32.mrf.mxu1 }
 0x17d   : > { %1316 = vrot.lane.b32.xlu1 %v4251_v10, %s3771_s4 }
 0x1eb   : > { %v1204_v13 = vpop.permute.xlu0 %1203  ;;  %v1265_v15 = vpop.permute.xlu1 %1264 }
 0x1ec   : > { %v1210_v14 = vsel %vm1205_vm3, %v1204_v13, 0  ;;  %v1271_v16 = vsel %vm1269_vm4, %v1265_v15, 0 }
 0x1ed   : > { %3162 = vmatpush3.bf16.xpose.msra.mxu1 %v1210_v14 }
 0x1ee   : > { %3167 = vmatprep.subr.bf16.mxu1 %v3767_v2 }
 0x1ef   : > { %v1317_v32 = vpop.permute.xlu1 %1316 }
 0x1f0   : > { %v1322_v38 = vsel %vm1205_vm3, %v1317_v32, 0 }
 0x1f4   : > { %3164 = vmatmul.mubr.msk.bf16.vlgmr.msra.gmra.mxu1 %vm1205_vm3, %v4251_v10 }
 0x1f5   : > { %3168 = vmatpush3.bf16.msra.mxu1 %v1271_v16  ;;  %3169 = vmatprep.mubr.msk.bf16.mxu1 %vm3768_vm1, %v3767_v2 }
 0x1f6   : > { %3173 = vmatprep.subr.bf16.mxu1 %v3767_v2 }
 0x2b4   : > { %v1246_v21 = vpop.f32.mrf.mxu1 }
 0x2b5   : > { %v1247_v22 = vadd.f32 %v1246_v21, %v4270_v20 }
 0x2b6   : > { %v3165_v23 = vpop.f32.mrf.mxu1 }
 0x2b7   : > { %v1252_v24 = vsel %vm1205_vm3, %v1247_v22, -inf }
 0x2b8   : > { %v1249_v25 = vpop.f32.mrf.mxu1  ;;  %1253 = vmax.xlane.f32.xlu0 %v1252_v24 }
 0x2ba   : > { %v3166_v26 = vpop.f32.mrf.mxu1 }
 0x2ce   : > { %1538 = vrot.lane.b32.xlu0 %v4251_v10, %s3772_s19 }
 0x341   : > { %v1254_v27 = vpop.xlane.xlu0 %1253 }
 0x342   : > { %v1255_v28 = vsub.f32 %v1247_v22, %v1254_v27 }
 0x344   : > { %v1256_v29 = vmul.f32 1.442695, %v1255_v28 }
 0x345   : > { %v1539_v41 = vpop.permute.xlu0 %1538 }
 0x346   : > { %3475 = vpow2.f32 %v1256_v29  ;;  %v1544_v43 = vsel %vm1205_vm3, %v1539_v41, 0 }
 0x353   : > { %v3476_v30 = vpop.eup %3475 }
 0x354   : > { %v1258_v31 = vsel %vm1205_vm3, %v3476_v30, 0.0 }
 0x355   : > { %1259 = vadd.xlane.f32.xlu1 %v1258_v31 }
 0x366   : > { %1314 = vrot.lane.b32.xlu1 %v4251_v10, %s3773_s12 }
 0x36a   : > { %1427 = vrot.lane.b32.xlu1 %v4251_v10, %s3774_s14 }
 0x36e   : > { %1425 = vrot.lane.b32.xlu1 %v4251_v10, %s3775_s10 }
 0x372   : > { %1536 = vrot.lane.b32.xlu1 %v4251_v10, %s3776_s8 }
 0x3de   : > { %v1260_v33 = vpop.xlane.xlu1 %1259 }
 0x3df   : > { %3477 = vrcp.f32 %v1260_v33 }
 0x3e2   : > { %v1315_v37 = vpop.permute.xlu1 %1314 }
 0x3e6   : > { %v1428_v39 = vpop.permute.xlu1 %1427 }
 0x3e7   : > { %v1433_v40 = vsel %vm1205_vm3, %v1428_v39, 0 }
 0x3ea   : > { %v1426_v42 = vpop.permute.xlu1 %1425 }
 0x3ec   : > { %v3478_v34 = vpop.eup %3477 }
 0x3ed   : > { %v1262_v35 = vmul.f32 %v3478_v34, %v3476_v30 }
 0x3ee   : > { %v1537_v44 = vpop.permute.xlu1 %1536 }
 0x3ef   : > { %v1263_v36 = vpack.c.bf16 %v1262_v35, %v1262_v35 }
 0x3f1   : > { %3170 = vmatmul.mubr.msk.bf16.vlgmr.msra.gmra.mxu1 %vm1205_vm3, %v1263_v36 }
 0x3f2   : > { %3174 = vmatpush3.bf16.xpose.msra.mxu1 %v1322_v38  ;;  %3175 = vmatprep.mubr.msk.bf16.mxu1 %vm3768_vm1, %v3767_v2 }
 0x3f3   : > { %3185 = vmatprep.subr.bf16.mxu1 %v3767_v2 }
 0x3f9   : > { %3176 = vmatmul.mubr.msk.bf16.vlgmr.msra.gmra.mxu1 %vm1205_vm3, %v1315_v37 }
 0x3fa   : > { %3186 = vmatpush3.bf16.xpose.msra.mxu1 %v1433_v40  ;;  %3187 = vmatprep.mubr.msk.bf16.mxu1 %vm3768_vm1, %v3767_v2 }
 0x3fb   : > { %3197 = vmatprep.subr.bf16.mxu1 %v3767_v2 }
 0x401   : > { %3188 = vmatmul.mubr.msk.bf16.vlgmr.msra.gmra.mxu1 %vm1205_vm3, %v1426_v42 }
 0x402   : > { %3198 = vmatpush3.bf16.xpose.msra.mxu1 %v1544_v43  ;;  %3199 = vmatprep.mubr.msk.bf16.mxu1 %vm3768_vm1, %v3767_v2 }
 0x403   : > { %3209 = vmatprep.subr.bf16.mxu1 %v3767_v2 }
 0x409   : > { %3200 = vmatmul.mubr.msk.bf16.vlgmr.msra.gmra.mxu1 %vm1205_vm3, %v1537_v44  ;;  %v3457_v44 = vld [vmem:[%s4160_s17 + $0x8] sm:$0xff]  }
 0x40a   : > { %3213 = vmatprep.mubr.msk.bf16.mxu1 %vm3768_vm1, %v3767_v2  ;;  %3210 = vmatpush3.bf16.msra.mxu1 %v3457_v44 }
 0x40b   : > { %3211 = vmatprep.subr.bf16.mxu1 %v3767_v2 }
 0x4b1   : > { %v4303_v45 = vpop.f32.mrf.mxu1 }
 0x4b3   : > { %v3171_v46 = vpop.f32.mrf.mxu1 }
 0x4b4   : > { %v3458_v46 = vld [vmem:[%s4160_s17] sm:$0xff]   ;;  %s4711_s17 = sld [smem:[#allocation46_spill]] }
 0x4b5   : > { %v1310_v47 = vpop.f32.mrf.mxu1  ;;  %3212 = vmatpush3.bf16.msra.mxu1 %v3458_v46 }
 0x4b6   : > { %3225 = vmatprep.subr.bf16.mxu1 %v3767_v2 }
 0x4b7   : > { %v3172_v48 = vpop.f32.mrf.mxu1 }
 0x4b9   : > { %v1358_v49 = vpop.f32.mrf.mxu1 }
 0x4ba   : > { %v1359_v50 = vadd.f32 %v1358_v49, %v4270_v20  ;;  %s4712_s0 = scalar_lea.vmem %s4711_s17, %s4147_s22 }
 0x4bb   : > { %v3177_v51 = vpop.f32.mrf.mxu1 }
 0x4bc   : > { %v1364_v52 = vsel %vm1205_vm3, %v1359_v50, -inf }
 0x4bd   : > { %1365 = vmax.xlane.f32.xlu1 %v1364_v52  ;;  %v1361_v53 = vpop.f32.mrf.mxu1 }
 0x4bf   : > { %v3178_v54 = vpop.f32.mrf.mxu1 }
 0x4c1   : > { %v1469_v55 = vpop.f32.mrf.mxu1 }
 0x4c2   : > { %v1470_v56 = vadd.f32 %v1469_v55, %v4270_v20 }
 0x4c3   : > { %v3189_v57 = vpop.f32.mrf.mxu1 }
 0x4c4   : > { %v1475_v58 = vsel %vm1205_vm3, %v1470_v56, -inf }
 0x4c5   : > { %1476 = vmax.xlane.f32.xlu0 %v1475_v58  ;;  %v1472_v59 = vpop.f32.mrf.mxu1  ;;  %v1313_v58 = vpack.c.bf16 %v4303_v45, %v4303_v45  ;;  %v3038_v45 = vld [vmem:[%s4706_s9] ss:$0 sm:$0xff] }
 0x4c7   : > { %v3190_v60 = vpop.f32.mrf.mxu1 }
 0x4c9   : > { %v1580_v61 = vpop.f32.mrf.mxu1 }
 0x4ca   : > { %v1581_v62 = vadd.f32 %v1580_v61, %v4270_v20 }
 0x4cb   : > { %v3201_v63 = vpop.f32.mrf.mxu1 }
 0x4cc   : > { %v1586_v0 = vsel %vm1205_vm3, %v1581_v62, -inf }
 0x4cd   : > { %1587 = vmax.xlane.f32.xlu1 %v1586_v0  ;;  %v1583_v1 = vpop.f32.mrf.mxu1 }
 0x4cf   : > { %v3202_v3 = vpop.f32.mrf.mxu1 }
 0x546   : > { %v1366_v5 = vpop.xlane.xlu1 %1365 }
 0x547   : > { %v1367_v6 = vsub.f32 %v1359_v50, %v1366_v5 }
 0x549   : > { %v1368_v7 = vmul.f32 1.442695, %v1367_v6 }
 0x54b   : > { %3479 = vpow2.f32 %v1368_v7 }
 0x54e   : > { %v1477_v16 = vpop.xlane.xlu0 %1476 }
 0x54f   : > { %v1478_v17 = vsub.f32 %v1470_v56, %v1477_v16  ;;  %v1127_v16 = vld [vmem:[%s4122_s21] sm:$0xff] }
 0x551   : > { %v1479_v18 = vmul.f32 1.442695, %v1478_v17  ;;  %v1128_v17 = vld [vmem:[%s4122_s21 + $0x8] sm:$0xff]  ;;  %s4720_s21 = sld [smem:[#allocation50_spill]] }
 0x556   : > { %v1588_v8 = vpop.xlane.xlu1 %1587 }
 0x557   : > { %v1589_v9 = vsub.f32 %v1581_v62, %v1588_v8 }
 0x558   : > { %v3480_v11 = vpop.eup %3479 }
 0x559   : > { %v1590_v12 = vmul.f32 1.442695, %v1589_v9  ;;  %v1370_v13 = vsel %vm1205_vm3, %v3480_v11, 0.0  ;;  %v3459_v9 = vld [vmem:[%s4182_s6 + $0x8] sm:$0xff]  }
 0x55a   : > { %1371 = vadd.xlane.f32.xlu1 %v1370_v13 }
 0x55b   : > { %3481 = vpow2.f32 %v1590_v12 }
 0x55c   : > { %3483 = vpow2.f32 %v1479_v18  ;;  %v1828_v18 = vpack.c.bf16 %v1128_v17, %v1127_v16 }
 0x568   : > { %v3482_v14 = vpop.eup %3481 }
 0x569   : > { %v1592_v15 = vsel %vm1205_vm3, %v3482_v14, 0.0  ;;  %v3484_v20 = vpop.eup %3483 }
 0x56a   : > { %1593 = vadd.xlane.f32.xlu0 %v1592_v15  ;;  %v1481_v21 = vsel %vm1205_vm3, %v3484_v20, 0.0 }
 0x56b   : > { %1376 = vrot.lane.b32.xlu1 %v4251_v10, %s3777_s29  ;;  %s4709_s29 = scalar_lea.vmem %s4708_s16, %s4147_s22  ;;  %s4721_s16 = scalar_lea.vmem %s4720_s21, %s4147_s22 }
 0x580   : > { %1487 = vrot.lane.b32.xlu0 %v4251_v10, %s3778_s24  ;;  %s4710_s24 = scalar_lea.vmem [#allocation8], %s4707_s7  ;;  %s4713_s7 = sld [smem:[#allocation44_spill]] }
 0x58f   : > { %1482 = vadd.xlane.f32.xlu1 %v1481_v21  ;;  %v3462_v21 = vld [vmem:[%s4173_s20] sm:$0xff]  }
 0x5a0   : > { %1598 = vrot.lane.b32.xlu1 %v4251_v10, %s3779_s11 }
 0x5e3   : > { %v1372_v22 = vpop.xlane.xlu1 %1371 }
 0x5e4   : > { %3485 = vrcp.f32 %v1372_v22 }
 0x5e7   : > { %v1377_v23 = vpop.permute.xlu1 %1376 }
 0x5e8   : > { %v1382_v24 = vsel %vm1269_vm4, %v1377_v23, 0 }
 0x5e9   : > { %3180 = vmatpush3.bf16.msra.mxu0 %v1382_v24 }
 0x5ea   : > { %3191 = vmatprep.subr.bf16.mxu0 %v3767_v2 }
 0x5f1   : > { %v3486_v25 = vpop.eup %3485 }
 0x5f2   : > { %v1374_v26 = vmul.f32 %v3486_v25, %v3480_v11  ;;  %v3460_v11 = vld [vmem:[%s4182_s6] sm:$0xff]   ;;  %s4714_s6 = scalar_lea.vmem %s4713_s7, %s4147_s22 }
 0x5f3   : > { %v1594_v27 = vpop.xlane.xlu0 %1593 }
 0x5f4   : > { %v1375_v28 = vpack.c.bf16 %v1374_v26, %v1374_v26  ;;  %v3042_v26 = vld [vmem:[%s4709_s29] ss:$0 sm:$0xff] }
 0x5f6   : > { %3182 = vmatmul.mubr.msk.bf16.vlgmr.msra.gmra.mxu0 %vm1205_vm3, %v1375_v28  ;;  %v3043_v28 = vld [vmem:[%s4710_s24] ss:$0 sm:$0xff] }
 0x5f7   : > { %v1488_v29 = vpop.permute.xlu0 %1487  ;;  %3193 = vmatprep.mubr.msk.bf16.mxu0 %vm3768_vm1, %v3767_v2 }
 0x5f8   : > { %v1493_v10 = vsel %vm1269_vm4, %v1488_v29, 0 }
 0x5f9   : > { %3192 = vmatpush3.bf16.msra.mxu0 %v1493_v10 }
 0x5fa   : > { %3203 = vmatprep.subr.bf16.mxu0 %v3767_v2 }
 0x618   : > { %v1483_v30 = vpop.xlane.xlu1 %1482 }
 0x619   : > { %3487 = vrcp.f32 %v1483_v30 }
 0x61a   : > { %3489 = vrcp.f32 %v1594_v27 }
 0x61c   : > { %v1599_v33 = vpop.permute.xlu1 %1598 }
 0x61d   : > { %v1604_v36 = vsel %vm1269_vm4, %v1599_v33, 0 }
 0x626   : > { %v3488_v31 = vpop.eup %3487 }
 0x627   : > { %v1485_v32 = vmul.f32 %v3488_v31, %v3484_v20  ;;  %v3490_v35 = vpop.eup %3489  ;;  %v3461_v20 = vld [vmem:[%s4173_s20 + $0x8] sm:$0xff]   ;;  %v3048_v31 = vld [vmem:[%s4712_s0] ss:$0 sm:$0xff] }
 0x628   : > { %v1596_v37 = vmul.f32 %v3490_v35, %v3482_v14 }
 0x629   : > { %v1486_v34 = vpack.c.bf16 %v1485_v32, %v1485_v32 }
 0x62a   : > { %v1597_v38 = vpack.c.bf16 %v1596_v37, %v1596_v37 }
 0x62b   : > { %3194 = vmatmul.mubr.msk.bf16.vlgmr.msra.gmra.mxu0 %vm1205_vm3, %v1486_v34 }
 0x62c   : > { %3204 = vmatpush3.bf16.msra.mxu0 %v1604_v36  ;;  %3205 = vmatprep.mubr.msk.bf16.mxu0 %vm3768_vm1, %v3767_v2 }
 0x62d   : > { %3217 = vmatprep.subr.bf16.mxu0 %v3767_v2 }
 0x633   : > { %3206 = vmatmul.mubr.msk.bf16.vlgmr.msra.gmra.mxu0 %vm1205_vm3, %v1597_v38 }
 0x634   : > { %3221 = vmatprep.mubr.msk.bf16.mxu0 %vm3768_vm1, %v3767_v2  ;;  %3218 = vmatpush3.bf16.msra.mxu0 %v3461_v20 }
 0x635   : > { %3219 = vmatprep.subr.bf16.mxu0 %v3767_v2 }
 0x638   : > { %3220 = vmatpush3.bf16.msra.mxu0 %v3462_v21 }
 0x639   : > { %3233 = vmatprep.subr.bf16.mxu0 %v3767_v2 }
 0x6b6   : > { %v1418_v39 = vpop.f32.mrf.mxu0 }
 0x6b7   : > { %v1424_v40 = vpack.c.bf16 %v1418_v39, %v1418_v39 }
 0x6b8   : > { %v3183_v41 = vpop.f32.mrf.mxu0 }
 0x6b9   : > { %1648 = vrot.lane.b32.xlu1 %v1424_v40, %s3780_s28  ;;  %v3044_v40 = vld [vmem:[%s4714_s6] ss:$0 sm:$0xff] }
 0x6ba   : > { %v1421_v42 = vpop.f32.mrf.mxu0 }
 0x6bc   : > { %v3184_v43 = vpop.f32.mrf.mxu0 }
 0x6eb   : > { %v1529_v47 = vpop.f32.mrf.mxu0 }
 0x6ec   : > { %v1535_v48 = vpack.c.bf16 %v1529_v47, %v1529_v47 }
 0x6ed   : > { %v3195_v49 = vpop.f32.mrf.mxu0 }
 0x6ee   : > { %1651 = vrot.lane.b32.xlu0 %v1535_v48, %s3781_s30 }
 0x6ef   : > { %v1532_v50 = vpop.f32.mrf.mxu0 }
 0x6f1   : > { %v3196_v51 = vpop.f32.mrf.mxu0 }
 0x6f3   : > { %v1640_v52 = vpop.f32.mrf.mxu0 }
 0x6f4   : > { %v1646_v53 = vpack.c.bf16 %v1640_v52, %v1640_v52 }
 0x6f5   : > { %v3207_v54 = vpop.f32.mrf.mxu0 }
 0x6f6   : > { %1654 = vrot.lane.b32.xlu1 %v1646_v53, %s3782_s25 }
 0x6f7   : > { %v1643_v55 = vpop.f32.mrf.mxu0 }
 0x6f9   : > { %v3208_v56 = vpop.f32.mrf.mxu0 }
 0x72b   : > { %v1649_v57 = vpop.permute.xlu1 %1648 }
 0x72c   : > { %v1658_v60 = vsel %vm1205_vm3, %v1313_v58, %v1649_v57  ;;  %v3783_v57 = vmov -1e+30  }
 0x72d   : > { %v1125_v58 = vsel %vm1124_vm8, 0.0, %v3783_v57 }
 0x760   : > { %v1652_v59 = vpop.permute.xlu0 %1651 }
 0x761   : > { %v1661_v61 = vsel %vm1659_vm6, %v1658_v60, %v1652_v59 }
 0x768   : > { %v1655_v62 = vpop.permute.xlu1 %1654 }
 0x769   : > { %v1664_v63 = vsel %vm1662_vm7, %v1661_v61, %v1655_v62 }
 0x76a   : > { %3214 = vmatmul.mubr.msk.bf16.vlgmr.msra.gmra.mxu1 %vm1153_vm2, %v1664_v63 }
 0x76b   : > { %3229 = vmatprep.mubr.msk.bf16.mxu1 %vm3768_vm1, %v3767_v2  ;;  %3226 = vmatpush3.bf16.msra.mxu1 %v3459_v9 }
 0x76c   : > { %3227 = vmatprep.subr.bf16.mxu1 %v3767_v2 }
 0x76f   : > { %3228 = vmatpush3.bf16.msra.mxu1 %v3460_v11 }
 0x770   : > { %3239 = vmatprep.subr.bf16.mxu1 %v3767_v2 }
 0x772   : > { %3230 = vmatmul.mubr.msk.bf16.vlgmr.msra.gmra.mxu1 %vm1153_vm2, %v1828_v18 }
 0x773   : > { %3241 = vmatprep.mubr.msk.bf16.mxu1 %vm3768_vm1, %v3767_v2 }
 0x82a   : > { %v1720_v0 = vpop.f32.mrf.mxu1 }
 0x82b   : > { %v1721_v1 = vadd.f32 %v3038_v45, %v1720_v0 }
 0x82c   : > { %v3215_v3 = vpop.f32.mrf.mxu1 }
 0x82d   : > { %v1726_v5 = vadd.f32 %v1721_v1, %v4235_v4 }
 0x82e   : > { %v1723_v6 = vpop.f32.mrf.mxu1 }
 0x82f   : > { %v1729_v7 = vsel %vm1153_vm2, %v1726_v5, 0.0 }
 0x830   : > { %1730 = vadd.xlane.f32.xlu0 %v1729_v7  ;;  %v3216_v8 = vpop.f32.mrf.mxu1 }
 0x832   : > { %v1885_v32 = vpop.f32.mrf.mxu1 }
 0x833   : > { %v1886_v34 = vadd.f32 %v3048_v31, %v1885_v32 }
 0x834   : > { %v3231_v33 = vpop.f32.mrf.mxu1 }
 0x836   : > { %v1888_v35 = vpop.f32.mrf.mxu1 }
 0x837   : > { %v1889_v36 = vadd.f32 %v3048_v31, %v1888_v35 }
 0x838   : > { %v3232_v37 = vpop.f32.mrf.mxu1 }
 0x839   : > { %v4387_v38 = vpack.c.bf16 %v1889_v36, %v1886_v34 }
 0x83b   : > { %v1902_v39 = vsel %vm1205_vm3, %v4387_v38, 0 }
 0x846   : > { %2007 = vrot.lane.b32.xlu0 %v4387_v38, %s3773_s12 }
 0x84a   : > { %2116 = vrot.lane.b32.xlu0 %v4387_v38, %s3775_s10 }
 0x84e   : > { %2225 = vrot.lane.b32.xlu0 %v4387_v38, %s3776_s8 }
 0x8b9   : > { %v1731_v12 = vpop.xlane.xlu0 %1730 }
 0x8ba   : > { %v1733_v13 = vmul.f32 0.03125, %v1731_v12 }
 0x8bc   : > { %v1734_v4 = vsub.f32 %v1726_v5, %v1733_v13 }
 0x8bd   : > { %v2008_v44 = vpop.permute.xlu0 %2007 }
 0x8be   : > { %v1735_v14 = vmul.f32 %v1734_v4, %v1734_v4  ;;  %v2013_v47 = vsel %vm1205_vm3, %v2008_v44, 0 }
 0x8c0   : > { %v1736_v15 = vsel %vm1153_vm2, %v1735_v14, 0.0 }
 0x8c1   : > { %1737 = vadd.xlane.f32.xlu1 %v1736_v15  ;;  %v2117_v50 = vpop.permute.xlu0 %2116 }
 0x8c2   : > { %v2122_v52 = vsel %vm1205_vm3, %v2117_v50, 0 }
 0x8c5   : > { %v2226_v53 = vpop.permute.xlu0 %2225 }
 0x8c6   : > { %v2231_v55 = vsel %vm1205_vm3, %v2226_v53, 0 }
 0x94a   : > { %v1738_v22 = vpop.xlane.xlu1 %1737 }
 0x94b   : > { %v1739_v23 = vmul.f32 0.03125, %v1738_v22 }
 0x94d   : > { %v1740_v24 = vadd.f32 1e-05, %v1739_v23 }
 0x94f   : > { %3491 = vrsqrt.f32 %v1740_v24 }
 0x95c   : > { %v3492_v25 = vpop.eup %3491 }
 0x95d   : > { %v1742_v27 = vmul.f32 %v3492_v25, %v1734_v4 }
 0x95f   : > { %v1749_v29 = vmul.f32 %v3042_v26, %v1742_v27 }
 0x961   : > { %v4375_v10 = vadd.f32 %v3043_v28, %v1749_v29 }
 0x963   : > { %v1761_v30 = vpack.c.bf16 %v4375_v10, %v4375_v10 }
 0x965   : > { %3222 = vmatmul.mubr.msk.bf16.vlgmr.msra.gmra.mxu0 %vm1153_vm2, %v1761_v30 }
 0x966   : > { %3235 = vmatprep.mubr.msk.bf16.mxu0 %vm3768_vm1, %v3767_v2  ;;  %3234 = vmatpush3.bf16.xpose.msra.mxu0 %v1902_v39 }
 0x967   : > { %3245 = vmatprep.subr.bf16.mxu0 %v3767_v2 }
 0xa25   : > { %v1818_v41 = vpop.f32.mrf.mxu0 }
 0xa26   : > { %v1819_v42 = vadd.f32 %v3044_v40, %v1818_v41 }
 0xa27   : > { %v3223_v43 = vpop.f32.mrf.mxu0 }
 0xa28   : > { %v1896_v46 = vpack.c.bf16 %v1819_v42, %v1819_v42 }
 0xa29   : > { %v1821_v48 = vpop.f32.mrf.mxu0 }
 0xa2a   : > { %2005 = vrot.lane.b32.xlu1 %v1896_v46, %s3773_s12  ;;  %3236 = vmatmul.mubr.msk.bf16.vlgmr.msra.gmra.mxu0 %vm1205_vm3, %v1896_v46  ;;  %s4717_s12 = sld [smem:[#allocation34_spill]] }
 0xa2b   : > { %v3224_v49 = vpop.f32.mrf.mxu0  ;;  %3246 = vmatpush3.bf16.xpose.msra.mxu0 %v2013_v47  ;;  %3247 = vmatprep.mubr.msk.bf16.mxu0 %vm3768_vm1, %v3767_v2 }
 0xa2c   : > { %3257 = vmatprep.subr.bf16.mxu0 %v3767_v2 }
 0xa2e   : > { %2114 = vrot.lane.b32.xlu1 %v1896_v46, %s3775_s10 }
 0xa32   : > { %2223 = vrot.lane.b32.xlu1 %v1896_v46, %s3776_s8  ;;  %s4718_s8 = sld [smem:[#allocation49_spill]] }
 0xa9c   : > { %v2006_v51 = vpop.permute.xlu1 %2005 }
 0xa9d   : > { %3248 = vmatmul.mubr.msk.bf16.vlgmr.msra.gmra.mxu0 %vm1205_vm3, %v2006_v51 }
 0xa9e   : > { %3258 = vmatpush3.bf16.xpose.msra.mxu0 %v2122_v52  ;;  %3259 = vmatprep.mubr.msk.bf16.mxu0 %vm3768_vm1, %v3767_v2 }
 0xa9f   : > { %3269 = vmatprep.subr.bf16.mxu0 %v3767_v2 }
 0xaa0   : > { %v2115_v54 = vpop.permute.xlu1 %2114 }
 0xaa4   : > { %v2224_v56 = vpop.permute.xlu1 %2223 }
 0xaa5   : > { %3260 = vmatmul.mubr.msk.bf16.vlgmr.msra.gmra.mxu0 %vm1205_vm3, %v2115_v54 }
 0xaa6   : > { %3270 = vmatpush3.bf16.xpose.msra.mxu0 %v2231_v55  ;;  %3271 = vmatprep.mubr.msk.bf16.mxu0 %vm3768_vm1, %v3767_v2 }
 0xaa7   : > { %3281 = vmatprep.subr.bf16.mxu0 %v3767_v2 }
 0xaad   : > { %3272 = vmatmul.mubr.msk.bf16.vlgmr.msra.gmra.mxu0 %vm1205_vm3, %v2224_v56 }
 0xaae   : > { %3285 = vmatprep.mubr.msk.bf16.mxu0 %vm3768_vm1, %v3767_v2 }
 0xaea   : > { %v1938_v59 = vpop.f32.mrf.mxu0 }
 0xaeb   : > { %v1939_v60 = vadd.f32 %v1938_v59, %v1125_v58 }
 0xaec   : > { %v3237_v61 = vpop.f32.mrf.mxu0 }
 0xaed   : > { %v1944_v62 = vsel %vm1659_vm6, %v1939_v60, -inf }
 0xaee   : > { %1945 = vmax.xlane.f32.xlu0 %v1944_v62  ;;  %v1941_v63 = vpop.f32.mrf.mxu0 }
 0xaf0   : > { %v3238_v45 = vpop.f32.mrf.mxu0 }
 0xb5d   : > { %v2049_v0 = vpop.f32.mrf.mxu0 }
 0xb5e   : > { %v2050_v1 = vadd.f32 %v2049_v0, %v1125_v58  ;;  %v3463_v0 = vld [vmem:[%s4191_s27 + $0x8] sm:$0xff]  }
 0xb5f   : > { %v3249_v3 = vpop.f32.mrf.mxu0  ;;  %3282 = vmatpush3.bf16.msra.mxu0 %v3463_v0 }
 0xb60   : > { %v2055_v5 = vsel %vm1659_vm6, %v2050_v1, -inf  ;;  %v3464_v3 = vld [vmem:[%s4191_s27] sm:$0xff]   ;;  %3283 = vmatprep.subr.bf16.mxu0 %v3767_v2 }
 0xb61   : > { %2056 = vmax.xlane.f32.xlu1 %v2055_v5  ;;  %v2052_v6 = vpop.f32.mrf.mxu0 }
 0xb63   : > { %v3250_v7 = vpop.f32.mrf.mxu0  ;;  %3284 = vmatpush3.bf16.msra.mxu0 %v3464_v3 }
 0xb64   : > { %3297 = vmatprep.subr.bf16.mxu0 %v3767_v2 }
 0xb65   : > { %v2158_v8 = vpop.f32.mrf.mxu0 }
 0xb66   : > { %v2159_v19 = vadd.f32 %v2158_v8, %v1125_v58 }
 0xb67   : > { %v3261_v9 = vpop.f32.mrf.mxu0 }
 0xb68   : > { %v2164_v11 = vsel %vm1659_vm6, %v2159_v19, -inf }
 0xb69   : > { %2165 = vmax.xlane.f32.xlu0 %v2164_v11  ;;  %v2161_v12 = vpop.f32.mrf.mxu0 }
 0xb6b   : > { %v3262_v13 = vpop.f32.mrf.mxu0 }
 0xb6d   : > { %v2267_v4 = vpop.f32.mrf.mxu0 }
 0xb6e   : > { %v2268_v14 = vadd.f32 %v2267_v4, %v1125_v58 }
 0xb6f   : > { %v3273_v15 = vpop.f32.mrf.mxu0 }
 0xb70   : > { %v2273_v16 = vsel %vm1659_vm6, %v2268_v14, -inf }
 0xb71   : > { %2274 = vmax.xlane.f32.xlu0 %v2273_v16  ;;  %v2270_v17 = vpop.f32.mrf.mxu0 }
 0xb73   : > { %v3274_v18 = vpop.f32.mrf.mxu0 }
 0xb77   : > { %v1946_v20 = vpop.xlane.xlu0 %1945 }
 0xb78   : > { %v1947_v21 = vsub.f32 %v1939_v60, %v1946_v20 }
 0xb7a   : > { %v1948_v22 = vmul.f32 1.442695, %v1947_v21 }
 0xb7c   : > { %3493 = vpow2.f32 %v1948_v22 }
 0xb89   : > { %v3494_v23 = vpop.eup %3493 }
 0xb8a   : > { %v1950_v24 = vsel %vm1659_vm6, %v3494_v23, 0.0 }
 0xb8b   : > { %1951 = vadd.xlane.f32.xlu1 %v1950_v24 }
 0xb9c   : > { %1957 = vrot.lane.b32.xlu1 %v4387_v38, %s3770_s5 }
 0xbea   : > { %v2057_v25 = vpop.xlane.xlu1 %2056 }
 0xbeb   : > { %v2058_v26 = vsub.f32 %v2050_v1, %v2057_v25 }
 0xbed   : > { %v2059_v27 = vmul.f32 1.442695, %v2058_v26 }
 0xbef   : > { %3495 = vpow2.f32 %v2059_v27 }
 0xbf2   : > { %v2166_v28 = vpop.xlane.xlu0 %2165 }
 0xbf3   : > { %v2167_v29 = vsub.f32 %v2159_v19, %v2166_v28 }
 0xbf5   : > { %v2168_v30 = vmul.f32 1.442695, %v2167_v29 }
 0xbf7   : > { %3497 = vpow2.f32 %v2168_v30 }
 0xbfa   : > { %v2275_v31 = vpop.xlane.xlu0 %2274 }
 0xbfb   : > { %v2276_v32 = vsub.f32 %v2268_v14, %v2275_v31 }
 0xbfc   : > { %v3496_v33 = vpop.eup %3495 }
 0xbfd   : > { %v2277_v34 = vmul.f32 1.442695, %v2276_v32  ;;  %v2061_v35 = vsel %vm1659_vm6, %v3496_v33, 0.0 }
 0xbfe   : > { %2062 = vadd.xlane.f32.xlu0 %v2061_v35 }
 0xbff   : > { %3499 = vpow2.f32 %v2277_v34 }
 0xc04   : > { %v3498_v36 = vpop.eup %3497 }
 0xc05   : > { %v2170_v37 = vsel %vm1659_vm6, %v3498_v36, 0.0 }
 0xc06   : > { %2171 = vadd.xlane.f32.xlu1 %v2170_v37 }
 0xc0c   : > { %v3500_v39 = vpop.eup %3499 }
 0xc0d   : > { %v2279_v40 = vsel %vm1659_vm6, %v3500_v39, 0.0 }
 0xc0e   : > { %2280 = vadd.xlane.f32.xlu0 %v2279_v40  ;;  %v3465_v40 = vld [vmem:[%s4717_s12 + $0x8] sm:$0xff]  }
 0xc14   : > { %v1952_v41 = vpop.xlane.xlu1 %1951 }
 0xc15   : > { %3501 = vrcp.f32 %v1952_v41  ;;  %v3467_v41 = vld [vmem:[%s4213_s3 + $0x38] sm:$0xff]  }
 0xc17   : > { %2176 = vrot.lane.b32.xlu1 %v4387_v38, %s3774_s14 }
 0xc18   : > { %v1958_v42 = vpop.permute.xlu1 %1957 }
 0xc19   : > { %3240 = vmatpush3.bf16.msra.mxu1 %v1958_v42  ;;  %v3468_v42 = vld [vmem:[%s4213_s3 + $0x30] sm:$0xff]  }
 0xc1a   : > { %3251 = vmatprep.subr.bf16.mxu1 %v3767_v2 }
 0xc1b   : > { %2285 = vrot.lane.b32.xlu1 %v4387_v38, %s3772_s19 }
 0xc22   : > { %v3502_v43 = vpop.eup %3501 }
 0xc23   : > { %v1954_v44 = vmul.f32 %v3502_v43, %v3494_v23  ;;  %v3469_v43 = vld [vmem:[%s4213_s3 + $0x28] sm:$0xff]  }
 0xc24   : > { %2067 = vrot.lane.b32.xlu0 %v4387_v38, %s3771_s4  ;;  %s4715_s4 = sld [smem:[#allocation48_spill]] }
 0xc25   : > { %v1955_v46 = vpack.c.bf16 %v1954_v44, %v1954_v44  ;;  %v3470_v44 = vld [vmem:[%s4213_s3 + $0x20] sm:$0xff]  }
 0xc27   : > { %3242 = vmatmul.mubr.msk.bf16.vlgmr.msra.gmra.mxu1 %vm1659_vm6, %v1955_v46  ;;  %v3471_v46 = vld [vmem:[%s4213_s3 + $0x18] sm:$0xff]  }
 0xc28   : > { %3253 = vmatprep.mubr.msk.bf16.mxu1 %vm3768_vm1, %v3767_v2 }
 0xc2a   : > { %s4716_s19 = scalar_lea.vmem %s4715_s4, %s4147_s22 }
 0xc2b   : > { %v3060_v26 = vld [vmem:[%s4716_s19] ss:$0 sm:$0xff] }
 0xc87   : > { %v2063_v47 = vpop.xlane.xlu0 %2062 }
 0xc88   : > { %3503 = vrcp.f32 %v2063_v47  ;;  %v3472_v47 = vld [vmem:[%s4213_s3 + $0x10] sm:$0xff]  }
 0xc8f   : > { %v2172_v48 = vpop.xlane.xlu1 %2171 }
 0xc90   : > { %3505 = vrcp.f32 %v2172_v48 }
 0xc93   : > { %v2177_v54 = vpop.permute.xlu1 %2176 }
 0xc95   : > { %v3504_v49 = vpop.eup %3503 }
 0xc96   : > { %v2065_v51 = vmul.f32 %v3504_v49, %v3496_v33 }
 0xc97   : > { %v2281_v50 = vpop.xlane.xlu0 %2280  ;;  %v2286_v58 = vpop.permute.xlu1 %2285 }
 0xc98   : > { %3507 = vrcp.f32 %v2281_v50  ;;  %v2066_v53 = vpack.c.bf16 %v2065_v51, %v2065_v51 }
 0xc9b   : > { %v2068_v52 = vpop.permute.xlu0 %2067 }
 0xc9c   : > { %3252 = vmatpush3.bf16.msra.mxu1 %v2068_v52 }
 0xc9d   : > { %3263 = vmatprep.subr.bf16.mxu1 %v3767_v2  ;;  %v3506_v38 = vpop.eup %3505 }
 0xc9e   : > { %v2174_v55 = vmul.f32 %v3506_v38, %v3498_v36  ;;  %v3065_v38 = vld [vmem:[%s4721_s16] ss:$0 sm:$0xff] }
 0xc9f   : > { %3254 = vmatmul.mubr.msk.bf16.vlgmr.msra.gmra.mxu1 %vm1659_vm6, %v2066_v53 }
 0xca0   : > { %3264 = vmatpush3.bf16.msra.mxu1 %v2177_v54  ;;  %3265 = vmatprep.mubr.msk.bf16.mxu1 %vm3768_vm1, %v3767_v2  ;;  %v2175_v56 = vpack.c.bf16 %v2174_v55, %v2174_v55 }
 0xca1   : > { %3275 = vmatprep.subr.bf16.mxu1 %v3767_v2 }
 0xca5   : > { %v3508_v57 = vpop.eup %3507 }
 0xca6   : > { %v2283_v59 = vmul.f32 %v3508_v57, %v3500_v39  ;;  %v3473_v57 = vld [vmem:[%s4213_s3 + $0x8] sm:$0xff]  }
 0xca7   : > { %3266 = vmatmul.mubr.msk.bf16.vlgmr.msra.gmra.mxu1 %vm1659_vm6, %v2175_v56 }
 0xca8   : > { %3276 = vmatpush3.bf16.msra.mxu1 %v2286_v58  ;;  %3277 = vmatprep.mubr.msk.bf16.mxu1 %vm3768_vm1, %v3767_v2  ;;  %v2284_v60 = vpack.c.bf16 %v2283_v59, %v2283_v59  ;;  %v3474_v58 = vld [vmem:[%s4213_s3] sm:$0xff]  }
 0xca9   : > { %3289 = vmatprep.subr.bf16.mxu1 %v3767_v2  ;;  %v3066_v59 = vld [vmem:[%s1095_s13] ss:$0 sm:$0xff] }
 0xcaf   : > { %3278 = vmatmul.mubr.msk.bf16.vlgmr.msra.gmra.mxu1 %vm1659_vm6, %v2284_v60 }
 0xcb0   : > { %3293 = vmatprep.mubr.msk.bf16.mxu1 %vm3768_vm1, %v3767_v2  ;;  %3290 = vmatpush3.bf16.msra.mxu1 %v3465_v40 }
 0xcb1   : > { %3291 = vmatprep.subr.bf16.mxu1 %v3767_v2 }
 0xce7   : > { %v1997_v61 = vpop.f32.mrf.mxu1 }
 0xce8   : > { %v2003_v20 = vpack.c.bf16 %v1997_v61, %v1997_v61 }
 0xce9   : > { %v3243_v62 = vpop.f32.mrf.mxu1 }
 0xceb   : > { %v2000_v63 = vpop.f32.mrf.mxu1 }
 0xced   : > { %v3244_v45 = vpop.f32.mrf.mxu1 }
 0xd5f   : > { %v2107_v1 = vpop.f32.mrf.mxu1 }
 0xd60   : > { %v2113_v5 = vpack.c.bf16 %v2107_v1, %v2107_v1 }
 0xd61   : > { %v3255_v6 = vpop.f32.mrf.mxu1 }
 0xd62   : > { %2333 = vrot.lane.b32.xlu0 %v2113_v5, %s3780_s28  ;;  %s4719_s28 = scalar_lea.vmem %s4718_s8, %s4147_s22 }
 0xd63   : > { %v2110_v7 = vpop.f32.mrf.mxu1  ;;  %v3064_v52 = vld [vmem:[%s4719_s28] ss:$0 sm:$0xff] }
 0xd65   : > { %v3256_v8 = vpop.f32.mrf.mxu1 }
 0xd67   : > { %v2216_v19 = vpop.f32.mrf.mxu1 }
 0xd68   : > { %v2222_v9 = vpack.c.bf16 %v2216_v19, %v2216_v19 }
 0xd69   : > { %v3267_v11 = vpop.f32.mrf.mxu1 }
 0xd6a   : > { %2336 = vrot.lane.b32.xlu1 %v2222_v9, %s3781_s30 }
 0xd6b   : > { %v2219_v12 = vpop.f32.mrf.mxu1 }
 0xd6d   : > { %v3268_v13 = vpop.f32.mrf.mxu1 }
 0xd6f   : > { %v2325_v4 = vpop.f32.mrf.mxu1 }
 0xd70   : > { %v2331_v14 = vpack.c.bf16 %v2325_v4, %v2325_v4 }
 0xd71   : > { %v3279_v15 = vpop.f32.mrf.mxu1 }
 0xd72   : > { %2339 = vrot.lane.b32.xlu0 %v2331_v14, %s3782_s25 }
 0xd73   : > { %v2328_v16 = vpop.f32.mrf.mxu1 }
 0xd75   : > { %v3280_v17 = vpop.f32.mrf.mxu1 }
 0xdd4   : > { %v2334_v18 = vpop.permute.xlu0 %2333 }
 0xdd5   : > { %v2343_v22 = vsel %vm1205_vm3, %v2003_v20, %v2334_v18  ;;  %v3079_v20 = vld [vmem:[%s1106_s1] ss:$0 sm:$0xff] }
 0xddc   : > { %v2337_v21 = vpop.permute.xlu1 %2336 }
 0xddd   : > { %v2345_v23 = vsel %vm1659_vm6, %v2343_v22, %v2337_v21  ;;  %v3080_v22 = vld [vmem:[%s1109_s15] ss:$0 sm:$0xff] }
 0xde4   : > { %v2340_v24 = vpop.permute.xlu0 %2339 }
 0xde5   : > { %v2347_v25 = vsel %vm1662_vm7, %v2345_v23, %v2340_v24 }
 0xde6   : > { %3286 = vmatmul.mubr.msk.bf16.vlgmr.msra.gmra.mxu0 %vm1153_vm2, %v2347_v25 }
 0xde7   : > { %3313 = vmatprep.mubr.msk.bf16.mxu0 %vm3768_vm1, %v3767_v2  ;;  %3298 = vmatpush3.bf16.msra.mxu0 %v3467_v41 }
 0xde8   : > { %3299 = vmatprep.subr.bf16.mxu0 %v3767_v2 }
 0xdeb   : > { %3300 = vmatpush3.bf16.msra.mxu0 %v3468_v42 }
 0xdec   : > { %3301 = vmatprep.subr.bf16.mxu0 %v3767_v2 }
 0xdef   : > { %3302 = vmatpush3.bf16.msra.mxu0 %v3469_v43 }
 0xdf0   : > { %3303 = vmatprep.subr.bf16.mxu0 %v3767_v2 }
 0xdf3   : > { %3304 = vmatpush3.bf16.msra.mxu0 %v3470_v44 }
 0xdf4   : > { %3305 = vmatprep.subr.bf16.mxu0 %v3767_v2 }
 0xdf7   : > { %3306 = vmatpush3.bf16.msra.mxu0 %v3471_v46 }
 0xdf8   : > { %3307 = vmatprep.subr.bf16.mxu0 %v3767_v2 }
 0xdfb   : > { %3308 = vmatpush3.bf16.msra.mxu0 %v3472_v47 }
 0xdfc   : > { %3309 = vmatprep.subr.bf16.mxu0 %v3767_v2 }
 0xdff   : > { %3310 = vmatpush3.bf16.msra.mxu0 %v3473_v57 }
 0xe00   : > { %3311 = vmatprep.subr.bf16.mxu0 %v3767_v2  ;;  %v3070_v2 = vld [vmem:[%s1103_s2] ss:$0 sm:$0xff] }
 0xe03   : > { %3312 = vmatpush3.bf16.msra.mxu0 %v3474_v58 }
 0xea6   : > { %v2403_v27 = vpop.f32.mrf.mxu0 }
 0xea7   : > { %v2404_v28 = vadd.f32 %v3060_v26, %v2403_v27 }
 0xea8   : > { %v3287_v29 = vpop.f32.mrf.mxu0 }
 0xea9   : > { %v2409_v30 = vadd.f32 %v2404_v28, %v4375_v10  ;;  %v3466_v10 = vld [vmem:[%s4717_s12] sm:$0xff]  }
 0xeaa   : > { %v2406_v31 = vpop.f32.mrf.mxu0  ;;  %3292 = vmatpush3.bf16.msra.mxu1 %v3466_v10 }
 0xeab   : > { %v2412_v32 = vsel %vm1153_vm2, %v2409_v30, 0.0 }
 0xeac   : > { %2413 = vadd.xlane.f32.xlu1 %v2412_v32  ;;  %v3288_v33 = vpop.f32.mrf.mxu0 }
 0xf35   : > { %v2414_v34 = vpop.xlane.xlu1 %2413 }
 0xf36   : > { %v2415_v35 = vmul.f32 0.03125, %v2414_v34 }
 0xf38   : > { %v2416_v36 = vsub.f32 %v2409_v30, %v2415_v35 }
 0xf3a   : > { %v2417_v37 = vmul.f32 %v2416_v36, %v2416_v36 }
 0xf3c   : > { %v2418_v39 = vsel %vm1153_vm2, %v2417_v37, 0.0 }
 0xf3d   : > { %2419 = vadd.xlane.f32.xlu0 %v2418_v39 }
 0xfc6   : > { %v2420_v48 = vpop.xlane.xlu0 %2419 }
 0xfc7   : > { %v2421_v49 = vmul.f32 0.03125, %v2420_v48 }
 0xfc9   : > { %v2422_v50 = vadd.f32 1e-05, %v2421_v49 }
 0xfcb   : > { %3509 = vrsqrt.f32 %v2422_v50 }
 0xfd8   : > { %v3510_v51 = vpop.eup %3509 }
 0xfd9   : > { %v2424_v53 = vmul.f32 %v3510_v51, %v2416_v36 }
 0xfdb   : > { %v2431_v54 = vmul.f32 %v3064_v52, %v2424_v53 }
 0xfdd   : > { %v2438_v55 = vadd.f32 %v3065_v38, %v2431_v54 }
 0xfdf   : > { %v2443_v56 = vpack.c.bf16 %v2438_v55, %v2438_v55 }
 0xfe1   : > { %3294 = vmatmul.mubr.msk.bf16.vlgmr.msra.gmra.mxu1 %vm1153_vm2, %v2443_v56 }
0x10a1   : > { %v2500_v60 = vpop.f32.mrf.mxu1 }
0x10a2   : > { %v2501_v61 = vadd.f32 %v3066_v59, %v2500_v60 }
0x10a3   : > { %v3295_v62 = vpop.f32.mrf.mxu1 }
0x10a4   : > { %v2506_v63 = vmax.f32 %v2501_v61, 0.0 }
0x10a5   : > { %v2503_v45 = vpop.f32.mrf.mxu1 }
0x10a6   : > { %v2507_v0 = vpack.c.bf16 %v2506_v63, %v2506_v63 }
0x10a7   : > { %v3296_v1 = vpop.f32.mrf.mxu1 }
0x10a8   : > { %3314 = vmatmul.mubr.bf16.vlgmr.msra.gmra.mxu0 %v2507_v0 }
0x1168   : > { %v2613_v3 = vpop.f32.mrf.mxu0 }
0x1169   : > { %v2614_v5 = vadd.f32 %v3070_v2, %v2613_v3 }
0x116a   : > { %v3315_v6 = vpop.f32.mrf.mxu0 }
0x116b   : > { %v2619_v7 = vadd.f32 %v2614_v5, %v2438_v55 }
0x116c   : > { %v2616_v8 = vpop.f32.mrf.mxu0 }
0x116d   : > { %v2622_v19 = vsel %vm1153_vm2, %v2619_v7, 0.0 }
0x116e   : > { %2623 = vadd.xlane.f32.xlu0 %v2622_v19  ;;  %v3316_v9 = vpop.f32.mrf.mxu0 }
0x11f7   : > { %v2624_v11 = vpop.xlane.xlu0 %2623 }
0x11f8   : > { %v2625_v12 = vmul.f32 0.03125, %v2624_v11 }
0x11fa   : > { %v2626_v13 = vsub.f32 %v2619_v7, %v2625_v12 }
0x11fc   : > { %v2627_v4 = vmul.f32 %v2626_v13, %v2626_v13 }
0x11fe   : > { %v2628_v14 = vsel %vm1153_vm2, %v2627_v4, 0.0 }
0x11ff   : > { %2629 = vadd.xlane.f32.xlu1 %v2628_v14 }
0x1288   : > { %v2630_v15 = vpop.xlane.xlu1 %2629 }
0x1289   : > { %v2631_v16 = vmul.f32 0.03125, %v2630_v15 }
0x128b   : > { %v2632_v17 = vadd.f32 1e-05, %v2631_v16 }
0x128d   : > { %3511 = vrsqrt.f32 %v2632_v17 }
0x129a   : > { %v3512_v18 = vpop.eup %3511 }
0x129b   : > { %v2634_v21 = vmul.f32 %v3512_v18, %v2626_v13 }
0x129d   : > { %v2641_v23 = vmul.f32 %v3079_v20, %v2634_v21  ;;  %2653 = sbr.rel (%p3081_p2) target bundleno = 4773 (0x12a5), region = 132 }
0x129f   : > { %v2648_v24 = vadd.f32 %v3080_v22, %v2641_v23 }
0x12a1   : > { %2649 = vst.msk [vmem:[#allocation2] sm:$0xff] %vm1153_vm2, %v2648_v24 }
0x12a2   : > { %v2654_v25 = vpack.c.bf16 %v2648_v24, %v2648_v24  ;;  %vm2655_vm9 = vcmask 257024  }
0x12a4   : > { %2656 = vst.msk [vmem:[%s4227_s18] sm:$0xf] %vm2655_vm9, %v2654_v25 }
0x12a5 PF: > { %s4726_s6 = sld [smem:[#allocation22_spill]]  ;;  %s2671_s12 = sshll.u32 %s4227_s18, 4  ;;  %s2672_s12 = int_to_ptr.vmem [resolvable:$true] %s2671_s12 }
0x12a6   : > { %s4727_s1 = sld [smem:[#allocation32_spill]]  ;;  %s3625_s10 = scalar_lea.vmem %s2672_s12, 64 }
0x12a7   : > { %s4729_s15 = sld [smem:[#allocation57_spill]]  ;;  %p3626_p11 = scmp.ne.s32.totalorder %s2672_s12, %s3625_s10 }
0x12a8   : > { %s3784_s23 = smov [#allocation11]  }
0x12a9   : > { %p3627_p8 = pnand %p3626_p11, %p3969_p6  ;;  %s3629_s8 = sshll.u32 %s3784_s23, 4  ;;  %s3630_s8 = int_to_ptr.vmem [resolvable:$false] %s3629_s8 }
0x12aa   : > { %s3631_s28 = scalar_lea.vmem %s3630_s8, 128  ;;  %p3632_p9 = scmp.lt.s32.totalorder %s2672_s12, %s3630_s8 }
0x12ab   : > { %s3083_s5 = sshll.u32 %s4726_s6, 6  ;;  %p3628_p0 = pneg %p3627_p8 }
0x12ac   : > { %s2658_s14 = scalar_lea.sflag [#allocation5], %s4727_s1  ;;  %p3633_p10 = scmp.lt.s32.totalorder %s3631_s28, %s3625_s10 }
0x12ad   : > { %s2669_s19 = scalar_lea.hbm %s4729_s15, %s3083_s5 }
0x12ae   : > { %p3634_p5 = por %p3633_p10, %p3632_p9 }
0x12b0   : > { %p3635_p4 = pnand %p3634_p5, %p3628_p0 }
0x12b2   : > { %3638 = shalt.err (!%p3635_p4)
}
0x12b3   : > { %s3639_s30 = scalar_lea.hbm %s2669_s19, 64  ;;  %s3643_s21 = scalar_lea.hbm %s4729_s15, 128 }
0x12b4   : > { %p3640_p12 = scmp.ne.s32.totalorder %s2669_s19, %s3639_s30  ;;  %p3644_p3 = scmp.lt.s32.totalorder %s2669_s19, %s4729_s15 }
0x12b5   : > { %p3645_p2 = scmp.lt.s32.totalorder %s3643_s21, %s3639_s30 }
0x12b6   : > { %p3641_p1 = pnand %p3640_p12, %p3969_p6 }
0x12b7   : > { %p3646_p11 = por %p3645_p2, %p3644_p3 }
0x12b8   : > { %p3642_p13 = pneg %p3641_p1 }
0x12ba   : > { %p3647_p8 = pnand %p3646_p11, %p3642_p13 }
0x12bc   : > { %3650 = shalt.err (!%p3647_p8)
}
0x12bd   : > { %3325 = dma.vmem_to_hbm [thread:$0]  (%p3969_p6), %s2672_s12, 64, %s2669_s19, %s2658_s14  }
0x12be PF: > { %s4730_s24 = sld [smem:[#allocation25_spill]] }
0x12bf   : > { %s4731_s20 = sld [smem:[#allocation19_spill]] }
0x12c4   : > { %p3345_p0 = scmp.ge.s32.totalorder %s4730_s24, 2 }
0x12c5   : > { %s2683_s17 = sand.u32 1, %s4731_s20  }
0x12c6   : > { %p3341_p9 = pnand %p3345_p0, %p3976_p7  ;;  %s2684_s0 = scalar_lea.sflag [#allocation5], %s2683_s17 }
0x12c8   : > { %p3342_p10 = pneg %p3341_p9 }
0x12ca   : > { %3712 = dma.done.wait (%p3342_p10), %s2684_s0, 64  }
0x12cb   : > { %3714 = vsyncadd (%p3342_p10), %s2684_s0, 4294967232  ;;  %s44_s6 = sadd.s32 1, %s4730_s24   ;;  %s4733_s3 = sld [smem:[#allocation17_spill]] }
0x12cc   : > { %p41_p5 = scmp.ge.s32.totalorder %s44_s6, 8   ;;  %s4734_s28 = sld [smem:[#allocation18_spill]] }
0x12cd   : > { %s4735_s29 = sld [smem:[#allocation30_spill]] }
0x12ce   : > { %s4736_s30 = sld [smem:[#allocation20_spill]] }
0x12cf   : > { %s4737_s4 = sld [smem:[#allocation21_spill]] }
0x12d0   : > { %s4738_s0 = sld [smem:[#allocation31_spill]]  ;;  %43 = sbr.rel (!%p41_p5) target bundleno = 37 (0x25), region = 252 }
0x12d1   : > { %s4739_s23 = sld [smem:[#allocation23_spill]] }
0x12d2   : > { %s4740_s1 = sld [smem:[#allocation24_spill]] }
0x12d3   : > { %s4741_s5 = sld [smem:[#allocation28_spill]] }
0x12d4   : > { %s4742_s24 = sld [smem:[#allocation29_spill]] }
0x12d5   :  { %2689 = vsyncpa [#allocation4], 1 }
0x12d6   :  { %2691 = vsyncpa [#allocation4 + $0x1], 1 }
0x12d7   :  { %2692 = vsyncpa [#allocation7], 1 }
0x12d8   :  { %2694 = vsyncpa [#allocation7 + $0x1], 1 }
0x12d9   :  { %2695 = vsyncpa [#allocation10], 1 }
0x12da   :  { %2697 = vsyncpa [#allocation10 + $0x1], 1 }
0x12db   :  { %2698 = vsyncpa [#allocation5], 1 }
0x12dc   :  { %2700 = vsyncpa [#allocation5 + $0x1], 1 }

</bundles_post_ra>
